<compile_context>
chip_gen: v7x
topology: tpu7x:2x2x1
jax: 0.10.0
libtpu: 0.0.40
codegen_flags: <defaults>
</compile_context>

<pallas_src>
import functools

import jax
import jax.numpy as jnp
import numpy as np
from jax.experimental import pallas as pl
from jax.experimental.pallas import tpu as pltpu


def _feature_diff_se_kernel(f1_ref, f2_ref, wd_ref, bd_ref, w1_ref, b1_ref,
                            w2_ref, b2_ref, o_ref, *, inv_hw):
    """One grid step: (Nb, C, HW) slabs of f1/f2 -> gated output slab."""
    nb = f1_ref.shape[0]
    wd = wd_ref[...]      # (C, 4C)  BN-folded 1x1 diff-conv, cols [f1|f2|diff|sim]
    bd = bd_ref[...]      # (C, 1)   BN-folded bias
    w1 = w1_ref[...]      # (Cr, C)
    b1 = b1_ref[...]      # (Cr, 1)
    w2 = w2_ref[...]      # (C, Cr)
    b2 = b2_ref[...]      # (C, 1)

    # Pass 1: diff-conv (single deep-K MXU matmul per item) + ReLU.  Un-gated
    # activations are staged in the output VMEM block (no extra scratch);
    # (C, 1) pooled columns are collected for a single batched SE below.
    pooled_cols = []
    for b in range(nb):                          # Nb is small & static (unrolled)
        f1 = f1_ref[b].astype(jnp.float32)       # (C, HW)
        f2 = f2_ref[b].astype(jnp.float32)
        diff = jnp.abs(f1 - f2)
        sim = f1 * f2
        x4 = jnp.concatenate([f1, f2, diff, sim], axis=0)              # (4C, HW)
        y = jnp.dot(wd, x4, preferred_element_type=jnp.float32) + bd   # (C, HW)
        y = jnp.maximum(y, 0.0)                  # ReLU (BN folded into wd/bd)
        # Global average pool: lane (HW) reduction on the XLU, * precomputed 1/HW.
        pooled_cols.append(jnp.sum(y, axis=-1, keepdims=True) * inv_hw)
        o_ref[b] = y.astype(o_ref.dtype)         # stage un-gated activations

    # Batched SE (hoisted out of the per-item loop): two lane-wider matmuls and
    # one sigmoid EUP pass instead of 2*Nb one-column matmuls + Nb sigmoids.
    pooled = jnp.concatenate(pooled_cols, axis=1)                       # (C, Nb)
    h = jnp.dot(w1, pooled, preferred_element_type=jnp.float32) + b1
    h = jnp.maximum(h, 0.0)                                             # (Cr, Nb)
    s = jax.nn.sigmoid(
        jnp.dot(w2, h, preferred_element_type=jnp.float32) + b2)        # (C, Nb)

    # Pass 2: per-channel gating of the staged activations.
    for b in range(nb):
        o_ref[b] = (o_ref[b].astype(jnp.float32) * s[:, b:b + 1]).astype(o_ref.dtype)


def _tpu_generation():
    """Return (num_tensorcores_per_chip, physical VMEM bytes) with safe fallbacks."""
    num_tc, vmem_cap = 1, 128 * 1024 * 1024
    try:
        kind = jax.devices()[0].device_kind.lower()
        if "v7" in kind:
            num_tc = 2            # v7x: two TensorCores per chip
    except Exception:
        pass
    try:
        cap = getattr(pltpu.get_tpu_info(), "vmem_capacity_bytes", None)
        if cap:
            vmem_cap = int(cap)
    except Exception:
        pass
    return num_tc, vmem_cap


def feature_diff_se_level(f1_nchw, f2_nchw, params, *, batch_block=None):
    """One level of FeatureDiffModule.forward (SE attention). NCHW in/out."""
    N, C, H, W = f1_nchw.shape
    HW = H * W
    assert HW % 128 == 0, "HW must be lane-dense (multiple of 128)"
    Cr = params["w_fc1"].shape[0]
    act_dtype = f1_nchw.dtype
    itemsize = f1_nchw.dtype.itemsize

    # NCHW -> (N, C, HW): pure reshape (no transpose, no extra HBM traffic).
    f1 = f1_nchw.reshape(N, C, HW)
    f2 = f2_nchw.reshape(N, C, HW)

    # Fold BatchNorm (eval mode) into the 1x1 diff-conv on the host:
    #   ((wd @ x4 + bd) * bns + bnb)  ==  (bns*wd) @ x4 + (bns*bd + bnb)
    bns, bnb = params["bn_scale"], params["bn_bias"]
    wd = params["w_diff"] * bns                    # (C, 4C) row scale
    bd = params["b_diff"] * bns + bnb              # (C, 1)
    w1, b1 = params["w_fc1"], params["b_fc1"]
    w2, b2 = params["w_fc2"], params["b_fc2"]
    weights = (wd, bd, w1, b1, w2, b2)
    weight_bytes = sum(int(np.prod(a.shape)) * 4 for a in weights)

    num_tc, vmem_cap = _tpu_generation()
    vmem_limit = min(vmem_cap // 2, 64 * 1024 * 1024)   # 64 MiB on 128 MiB chips, 32 MiB on v7x

    # --- per-step VMEM accounting --------------------------------------------
    # Double-buffered I/O blocks (f1, f2, out) + double-buffered weights +
    # in-kernel f32 temporaries (f1/f2 upcasts, diff, sim, x4 concat, y) with
    # headroom for two unrolled iterations' temporaries being live at once.
    io_per_item = 3 * C * HW * itemsize
    temp_per_item = 9 * C * HW * 4
    fixed_bytes = 2 * weight_bytes + 2 * temp_per_item

    if batch_block is None:
        budget = int(0.8 * vmem_limit) - fixed_bytes
        nb = max(1, budget // (2 * io_per_item))
        if num_tc > 1 and N >= num_tc:
            # v7x: keep >= num_tc grid steps so both TensorCores get work.
            nb = min(nb, max(1, N // num_tc))
        # Single-TC chips (v5e/v6e): let the block grow to N -> ideally 1 grid step.
        batch_block = int(min(nb, N))
    Nb = max(1, int(batch_block))

    grid_n = pl.cdiv(N, Nb)
    Np = grid_n * Nb
    if Np != N:                                    # pad instead of divisor search
        pad = ((0, Np - N), (0, 0), (0, 0))
        f1 = jnp.pad(f1, pad)
        f2 = jnp.pad(f2, pad)

    est_vmem = 2 * Nb * io_per_item + fixed_bytes
    assert est_vmem <= vmem_limit, (
        f"per-step VMEM estimate {est_vmem}B exceeds limit {vmem_limit}B; "
        "shrink batch_block or add an HW grid axis")
    # TODO(synk): for production-sized C*HW slabs (or v7x with N == 1) add an HW
    # grid axis with a two-phase SE (accumulate pooled sums per HW tile in
    # scratch, gate in a second sweep) so both TCs get work and the slab no
    # longer has to fit VMEM whole.

    act_spec = pl.BlockSpec((Nb, C, HW), lambda n: (n, 0, 0))

    def full(arr):
        nd = arr.ndim
        return pl.BlockSpec(arr.shape, lambda n, _nd=nd: (0,) * _nd)
    # Weight index_maps are constant across the grid; at production C, mark them
    # pipeline_mode=pl.Buffered(1) (or stage once into scratch) to drop the
    # redundant weight double buffer.  Negligible at these sizes.

    flops = (2 * Np * HW * (4 * C) * C            # diff conv
             + 8 * Np * C * HW                    # diff/sim/relu/gating elementwise
             + 4 * Np * C * Cr)                   # SE FCs
    bytes_accessed = 3 * Np * C * HW * itemsize + weight_bytes
    cost = pl.CostEstimate(flops=flops, transcendentals=Np * C,
                           bytes_accessed=bytes_accessed)

    kernel = functools.partial(_feature_diff_se_kernel, inv_hw=1.0 / HW)

    out = pl.pallas_call(
        kernel,
        out_shape=jax.ShapeDtypeStruct((Np, C, HW), act_dtype),
        grid_spec=pltpu.PrefetchScalarGridSpec(
            num_scalar_prefetch=0,
            grid=(grid_n,),
            in_specs=[act_spec, act_spec] + [full(a) for a in weights],
            out_specs=pl.BlockSpec((Nb, C, HW), lambda n: (n, 0, 0)),
        ),
        compiler_params=pltpu.CompilerParams(
            dimension_semantics=("parallel",),
            vmem_limit_bytes=vmem_limit),
        cost_estimate=cost,
    )(f1, f2, *weights)

    if Np != N:
        out = out[:N]
    return out.reshape(N, C, H, W)


def make_level_params(key, C, ratio=16):
    """Deterministic synthetic parameters for one level (channels-first, f32)."""
    Cr = max(C // ratio, 1)
    ks = jax.random.split(key, 10)
    # 1x1 conv weight as (C_out, 4*C_in); column blocks ordered [f1|f2|diff|sim].
    w_diff = jax.random.normal(ks[0], (C, 4 * C), jnp.float32) * 0.05
    b_diff = jax.random.normal(ks[1], (C, 1), jnp.float32) * 0.05
    # BatchNorm (eval mode), folded to scale/bias.
    gamma = 1.0 + 0.1 * jax.random.normal(ks[2], (C, 1), jnp.float32)
    beta = 0.1 * jax.random.normal(ks[3], (C, 1), jnp.float32)
    run_mean = 0.1 * jax.random.normal(ks[4], (C, 1), jnp.float32)
    run_var = jnp.abs(1.0 + 0.1 * jax.random.normal(ks[5], (C, 1), jnp.float32))
    eps = 1e-5
    bn_scale = gamma / jnp.sqrt(run_var + eps)
    bn_bias = beta - run_mean * bn_scale
    # SE (1x1 convs stored as (out, in) matrices).
    w_fc1 = jax.random.normal(ks[6], (Cr, C), jnp.float32) * 0.1
    b_fc1 = jax.random.normal(ks[7], (Cr, 1), jnp.float32) * 0.1
    w_fc2 = jax.random.normal(ks[8], (C, Cr), jnp.float32) * 0.1
    b_fc2 = jax.random.normal(ks[9], (C, 1), jnp.float32) * 0.1
    return dict(w_diff=w_diff, b_diff=b_diff, bn_scale=bn_scale, bn_bias=bn_bias,
                w_fc1=w_fc1, b_fc1=b_fc1, w_fc2=w_fc2, b_fc2=b_fc2)


def feature_diff_module(feats1, feats2, params_list):
    """FeatureDiffModule.forward over a list of feature levels (NCHW)."""
    # TODO(synk): the small pyramid levels are per-pallas_call-launch-overhead
    # bound; fuse levels into one call (level grid axis + scalar-prefetched
    # shapes/offsets) if end-to-end latency of tiny levels matters.
    return [feature_diff_se_level(f1, f2, p)
            for f1, f2, p in zip(feats1, feats2, params_list)]


def _reference_level(f1, f2, p):
    """Pure-JAX reference (NCHW), mirroring the PyTorch forward (SE, eval BN)."""
    diff = jnp.abs(f1 - f2)
    sim = f1 * f2
    concat = jnp.concatenate([f1, f2, diff, sim], axis=1)            # (N,4C,H,W)
    y = (jnp.einsum('nchw,oc->nohw', concat, p["w_diff"])
         + p["b_diff"][:, 0][None, :, None, None])
    y = (y * p["bn_scale"][:, 0][None, :, None, None]
         + p["bn_bias"][:, 0][None, :, None, None])
    y = jnp.maximum(y, 0.0)
    pooled = jnp.mean(y, axis=(2, 3))                                # (N, C)
    h = jnp.maximum(pooled @ p["w_fc1"].T + p["b_fc1"][:, 0][None], 0.0)
    s = jax.nn.sigmoid(h @ p["w_fc2"].T + p["b_fc2"][:, 0][None])    # (N, C)
    return y * s[:, :, None, None]


if __name__ == "__main__":
    key = jax.random.PRNGKey(0)
    in_channels_list = [32, 64]
    spatial_list = [32, 16]          # HW = 1024, 256 -> lane-dense (multiple of 128)
    N = 2

    k_feat, k_par = jax.random.split(key)
    feat_keys = jax.random.split(k_feat, 2 * len(in_channels_list))
    par_keys = jax.random.split(k_par, len(in_channels_list))

    feats1, feats2, params_list = [], [], []
    for i, (C, S) in enumerate(zip(in_channels_list, spatial_list)):
        feats1.append(jax.random.normal(feat_keys[2 * i], (N, C, S, S), jnp.float32))
        feats2.append(jax.random.normal(feat_keys[2 * i + 1], (N, C, S, S), jnp.float32))
        params_list.append(make_level_params(par_keys[i], C, ratio=16))

    outs = feature_diff_module(feats1, feats2, params_list)
    outs = [jax.block_until_ready(o) for o in outs]

    # Correctness vs pure-JAX reference (f32 path; BN folding reassociates so
    # allow a small tolerance on top of MXU default precision).
    for f1, f2, p, o in zip(feats1, feats2, params_list, outs):
        ref = _reference_level(f1, f2, p)
        np.testing.assert_allclose(np.asarray(o), np.asarray(ref),
                                   rtol=1e-4, atol=1e-4)

    # bf16 activation I/O path (halves HBM traffic on the mem-bound levels);
    # compute stays f32 inside the kernel, so only output quantization differs.
    f1_bf = feats1[0].astype(jnp.bfloat16)
    f2_bf = feats2[0].astype(jnp.bfloat16)
    out_bf = jax.block_until_ready(
        feature_diff_se_level(f1_bf, f2_bf, params_list[0]))
    ref_bf = _reference_level(f1_bf.astype(jnp.float32),
                              f2_bf.astype(jnp.float32), params_list[0])
    np.testing.assert_allclose(np.asarray(out_bf).astype(np.float32),
                               np.asarray(ref_bf), rtol=3e-2, atol=3e-2)

    # Odd batch size exercises the cdiv/pad path (no divisor search collapse).
    f1_odd = jnp.concatenate([feats1[0]] * 3, axis=0)[:3]
    f2_odd = jnp.concatenate([feats2[0]] * 3, axis=0)[:3]
    out_odd = jax.block_until_ready(
        feature_diff_se_level(f1_odd, f2_odd, params_list[0], batch_block=2))
    ref_odd = _reference_level(f1_odd, f2_odd, params_list[0])
    np.testing.assert_allclose(np.asarray(out_odd), np.asarray(ref_odd),
                               rtol=1e-4, atol=1e-4)

    print("KERNEL_OK")
</pallas_src>

<mosaic_0001>
module attributes {stable_mosaic.version = 11 : i64} {
  func.func @_feature_diff_se_kernel(%arg0: i32, %arg1: memref<2x32x1024xf32, #tpu.memory_space<vmem>>, %arg2: memref<2x32x1024xf32, #tpu.memory_space<vmem>>, %arg3: memref<32x128xf32, #tpu.memory_space<vmem>>, %arg4: memref<32x1xf32, #tpu.memory_space<vmem>>, %arg5: memref<2x32xf32, #tpu.memory_space<vmem>>, %arg6: memref<2x1xf32, #tpu.memory_space<vmem>>, %arg7: memref<32x2xf32, #tpu.memory_space<vmem>>, %arg8: memref<32x1xf32, #tpu.memory_space<vmem>>, %arg9: memref<2x32x1024xf32, #tpu.memory_space<vmem>>) attributes {dimension_semantics = [#tpu.dimension_semantics<parallel>], iteration_bounds = array<i64: 1>, scalar_prefetch = 0 : i64, scratch_operands = 0 : i64, tpu.core_type = #tpu.core_type<tc>, window_params = [{transform_indices = @transform_0, window_bounds = array<i64: 2, 32, 1024>}, {transform_indices = @transform_1, window_bounds = array<i64: 2, 32, 1024>}, {pipeline_mode = #tpu.pipeline_mode<synchronous>, transform_indices = @transform_2, window_bounds = array<i64: 32, 128>}, {pipeline_mode = #tpu.pipeline_mode<synchronous>, transform_indices = @transform_3, window_bounds = array<i64: 32, 1>}, {pipeline_mode = #tpu.pipeline_mode<synchronous>, transform_indices = @transform_4, window_bounds = array<i64: 2, 32>}, {pipeline_mode = #tpu.pipeline_mode<synchronous>, transform_indices = @transform_5, window_bounds = array<i64: 2, 1>}, {pipeline_mode = #tpu.pipeline_mode<synchronous>, transform_indices = @transform_6, window_bounds = array<i64: 32, 2>}, {pipeline_mode = #tpu.pipeline_mode<synchronous>, transform_indices = @transform_7, window_bounds = array<i64: 32, 1>}, {transform_indices = @transform_8, window_bounds = array<i64: 2, 32, 1024>}]} {
    %c0 = arith.constant 0 : index
    %c0_0 = arith.constant 0 : index
    %0 = vector.load %arg3[%c0, %c0_0] : memref<32x128xf32, #tpu.memory_space<vmem>>, vector<32x128xf32>
    %c0_1 = arith.constant 0 : index
    %c0_2 = arith.constant 0 : index
    %1 = vector.load %arg4[%c0_1, %c0_2] : memref<32x1xf32, #tpu.memory_space<vmem>>, vector<32x1xf32>
    %c0_3 = arith.constant 0 : index
    %c0_4 = arith.constant 0 : index
    %2 = vector.load %arg5[%c0_3, %c0_4] : memref<2x32xf32, #tpu.memory_space<vmem>>, vector<2x32xf32>
    %c0_5 = arith.constant 0 : index
    %c0_6 = arith.constant 0 : index
    %3 = vector.load %arg6[%c0_5, %c0_6] : memref<2x1xf32, #tpu.memory_space<vmem>>, vector<2x1xf32>
    %c0_7 = arith.constant 0 : index
    %c0_8 = arith.constant 0 : index
    %4 = vector.load %arg7[%c0_7, %c0_8] : memref<32x2xf32, #tpu.memory_space<vmem>>, vector<32x2xf32>
    %c0_9 = arith.constant 0 : index
    %c0_10 = arith.constant 0 : index
    %5 = vector.load %arg8[%c0_9, %c0_10] : memref<32x1xf32, #tpu.memory_space<vmem>>, vector<32x1xf32>
    %c0_11 = arith.constant 0 : index
    %c0_12 = arith.constant 0 : index
    %c0_13 = arith.constant 0 : index
    %6 = vector.load %arg1[%c0_11, %c0_12, %c0_13] : memref<2x32x1024xf32, #tpu.memory_space<vmem>>, vector<1x32x1024xf32>
    %7 = vector.shape_cast %6 : vector<1x32x1024xf32> to vector<32x1024xf32>
    %c0_14 = arith.constant 0 : index
    %c0_15 = arith.constant 0 : index
    %c0_16 = arith.constant 0 : index
    %8 = vector.load %arg2[%c0_14, %c0_15, %c0_16] : memref<2x32x1024xf32, #tpu.memory_space<vmem>>, vector<1x32x1024xf32>
    %9 = vector.shape_cast %8 : vector<1x32x1024xf32> to vector<32x1024xf32>
    %10 = arith.subf %7, %9 : vector<32x1024xf32>
    %11 = math.absf %10 : vector<32x1024xf32>
    %12 = arith.mulf %7, %9 : vector<32x1024xf32>
    %13 = tpu.concatenate %7, %9, %11, %12 in 0 : vector<32x1024xf32>, vector<32x1024xf32>, vector<32x1024xf32>, vector<32x1024xf32> -> vector<128x1024xf32>
    %cst = arith.constant dense<0.000000e+00> : vector<32x1024xf32>
    %14 = tpu.matmul %0, %13, %cst {dimension_numbers = #tpu.dot_dimension_numbers<[1], [0], [0], [1], [0, 0, 1, 1], [], []>} : vector<32x128xf32>, vector<128x1024xf32>, vector<32x1024xf32> -> vector<32x1024xf32>
    %15 = vector.broadcast %1 : vector<32x1xf32> to vector<32x1024xf32>
    %16 = arith.addf %14, %15 : vector<32x1024xf32>
    %cst_17 = arith.constant 0.000000e+00 : f32
    %17 = vector.broadcast %cst_17 : f32 to vector<32x1024xf32>
    %18 = arith.maximumf %16, %17 : vector<32x1024xf32>
    %cst_18 = arith.constant dense<0.000000e+00> : vector<32xf32>
    %19 = vector.multi_reduction <add>, %18, %cst_18 [1] : vector<32x1024xf32> to vector<32xf32>
    %20 = vector.shape_cast %19 : vector<32xf32> to vector<32x1xf32>
    %cst_19 = arith.constant 9.765625E-4 : f32
    %21 = vector.broadcast %cst_19 : f32 to vector<32x1xf32>
    %22 = arith.mulf %20, %21 : vector<32x1xf32>
    %c0_20 = arith.constant 0 : index
    %c0_21 = arith.constant 0 : index
    %c0_22 = arith.constant 0 : index
    %23 = vector.load %arg9[%c0_20, %c0_21, %c0_22] : memref<2x32x1024xf32, #tpu.memory_space<vmem>>, vector<1x32x1024xf32>
    %24 = vector.shape_cast %23 : vector<1x32x1024xf32> to vector<32x1024xf32>
    %25 = vector.shape_cast %18 : vector<32x1024xf32> to vector<1x32x1024xf32>
    tpu.vector_store %arg9[%c0_20, %c0_21, %c0_22], %25 {strides = array<i32>} : memref<2x32x1024xf32, #tpu.memory_space<vmem>>, vector<1x32x1024xf32>,
    %c1 = arith.constant 1 : index
    %c0_23 = arith.constant 0 : index
    %c0_24 = arith.constant 0 : index
    %26 = vector.load %arg1[%c1, %c0_23, %c0_24] : memref<2x32x1024xf32, #tpu.memory_space<vmem>>, vector<1x32x1024xf32>
    %27 = vector.shape_cast %26 : vector<1x32x1024xf32> to vector<32x1024xf32>
    %c1_25 = arith.constant 1 : index
    %c0_26 = arith.constant 0 : index
    %c0_27 = arith.constant 0 : index
    %28 = vector.load %arg2[%c1_25, %c0_26, %c0_27] : memref<2x32x1024xf32, #tpu.memory_space<vmem>>, vector<1x32x1024xf32>
    %29 = vector.shape_cast %28 : vector<1x32x1024xf32> to vector<32x1024xf32>
    %30 = arith.subf %27, %29 : vector<32x1024xf32>
    %31 = math.absf %30 : vector<32x1024xf32>
    %32 = arith.mulf %27, %29 : vector<32x1024xf32>
    %33 = tpu.concatenate %27, %29, %31, %32 in 0 : vector<32x1024xf32>, vector<32x1024xf32>, vector<32x1024xf32>, vector<32x1024xf32> -> vector<128x1024xf32>
    %cst_28 = arith.constant dense<0.000000e+00> : vector<32x1024xf32>
    %34 = tpu.matmul %0, %33, %cst_28 {dimension_numbers = #tpu.dot_dimension_numbers<[1], [0], [0], [1], [0, 0, 1, 1], [], []>} : vector<32x128xf32>, vector<128x1024xf32>, vector<32x1024xf32> -> vector<32x1024xf32>
    %35 = vector.broadcast %1 : vector<32x1xf32> to vector<32x1024xf32>
    %36 = arith.addf %34, %35 : vector<32x1024xf32>
    %cst_29 = arith.constant 0.000000e+00 : f32
    %37 = vector.broadcast %cst_29 : f32 to vector<32x1024xf32>
    %38 = arith.maximumf %36, %37 : vector<32x1024xf32>
    %cst_30 = arith.constant dense<0.000000e+00> : vector<32xf32>
    %39 = vector.multi_reduction <add>, %38, %cst_30 [1] : vector<32x1024xf32> to vector<32xf32>
    %40 = vector.shape_cast %39 : vector<32xf32> to vector<32x1xf32>
    %cst_31 = arith.constant 9.765625E-4 : f32
    %41 = vector.broadcast %cst_31 : f32 to vector<32x1xf32>
    %42 = arith.mulf %40, %41 : vector<32x1xf32>
    %c1_32 = arith.constant 1 : index
    %c0_33 = arith.constant 0 : index
    %c0_34 = arith.constant 0 : index
    %43 = vector.load %arg9[%c1_32, %c0_33, %c0_34] : memref<2x32x1024xf32, #tpu.memory_space<vmem>>, vector<1x32x1024xf32>
    %44 = vector.shape_cast %43 : vector<1x32x1024xf32> to vector<32x1024xf32>
    %45 = vector.shape_cast %38 : vector<32x1024xf32> to vector<1x32x1024xf32>
    tpu.vector_store %arg9[%c1_32, %c0_33, %c0_34], %45 {strides = array<i32>} : memref<2x32x1024xf32, #tpu.memory_space<vmem>>, vector<1x32x1024xf32>,
    %46 = tpu.concatenate %22, %42 in 1 : vector<32x1xf32>, vector<32x1xf32> -> vector<32x2xf32>
    %cst_35 = arith.constant dense<0.000000e+00> : vector<2x2xf32>
    %47 = tpu.matmul %2, %46, %cst_35 {dimension_numbers = #tpu.dot_dimension_numbers<[1], [0], [0], [1], [0, 0, 1, 1], [], []>} : vector<2x32xf32>, vector<32x2xf32>, vector<2x2xf32> -> vector<2x2xf32>
    %48 = vector.broadcast %3 : vector<2x1xf32> to vector<2x2xf32>
    %49 = arith.addf %47, %48 : vector<2x2xf32>
    %cst_36 = arith.constant 0.000000e+00 : f32
    %50 = vector.broadcast %cst_36 : f32 to vector<2x2xf32>
    %51 = arith.maximumf %49, %50 : vector<2x2xf32>
    %cst_37 = arith.constant dense<0.000000e+00> : vector<32x2xf32>
    %52 = tpu.matmul %4, %51, %cst_37 {dimension_numbers = #tpu.dot_dimension_numbers<[1], [0], [0], [1], [0, 0, 1, 1], [], []>} : vector<32x2xf32>, vector<2x2xf32>, vector<32x2xf32> -> vector<32x2xf32>
    %53 = vector.broadcast %5 : vector<32x1xf32> to vector<32x2xf32>
    %54 = arith.addf %52, %53 : vector<32x2xf32>
    %55 = arith.negf %54 : vector<32x2xf32>
    %56 = math.exp %55 : vector<32x2xf32>
    %cst_38 = arith.constant 1.000000e+00 : f32
    %57 = vector.broadcast %cst_38 : f32 to vector<32x2xf32>
    %58 = arith.addf %57, %56 : vector<32x2xf32>
    %59 = arith.divf %57, %58 : vector<32x2xf32>
    %c0_39 = arith.constant 0 : index
    %c0_40 = arith.constant 0 : index
    %c0_41 = arith.constant 0 : index
    %60 = vector.load %arg9[%c0_39, %c0_40, %c0_41] : memref<2x32x1024xf32, #tpu.memory_space<vmem>>, vector<1x32x1024xf32>
    %61 = vector.shape_cast %60 : vector<1x32x1024xf32> to vector<32x1024xf32>
    %62 = vector.extract_strided_slice %59 {offsets = [0, 0], sizes = [32, 1], strides = [1, 1]} : vector<32x2xf32> to vector<32x1xf32>
    %63 = vector.broadcast %62 : vector<32x1xf32> to vector<32x1024xf32>
    %64 = arith.mulf %61, %63 : vector<32x1024xf32>
    %c0_42 = arith.constant 0 : index
    %c0_43 = arith.constant 0 : index
    %c0_44 = arith.constant 0 : index
    %65 = vector.load %arg9[%c0_42, %c0_43, %c0_44] : memref<2x32x1024xf32, #tpu.memory_space<vmem>>, vector<1x32x1024xf32>
    %66 = vector.shape_cast %65 : vector<1x32x1024xf32> to vector<32x1024xf32>
    %67 = vector.shape_cast %64 : vector<32x1024xf32> to vector<1x32x1024xf32>
    tpu.vector_store %arg9[%c0_42, %c0_43, %c0_44], %67 {strides = array<i32>} : memref<2x32x1024xf32, #tpu.memory_space<vmem>>, vector<1x32x1024xf32>,
    %c1_45 = arith.constant 1 : index
    %c0_46 = arith.constant 0 : index
    %c0_47 = arith.constant 0 : index
    %68 = vector.load %arg9[%c1_45, %c0_46, %c0_47] : memref<2x32x1024xf32, #tpu.memory_space<vmem>>, vector<1x32x1024xf32>
    %69 = vector.shape_cast %68 : vector<1x32x1024xf32> to vector<32x1024xf32>
    %70 = vector.extract_strided_slice %59 {offsets = [0, 1], sizes = [32, 1], strides = [1, 1]} : vector<32x2xf32> to vector<32x1xf32>
    %71 = vector.broadcast %70 : vector<32x1xf32> to vector<32x1024xf32>
    %72 = arith.mulf %69, %71 : vector<32x1024xf32>
    %c1_48 = arith.constant 1 : index
    %c0_49 = arith.constant 0 : index
    %c0_50 = arith.constant 0 : index
    %73 = vector.load %arg9[%c1_48, %c0_49, %c0_50] : memref<2x32x1024xf32, #tpu.memory_space<vmem>>, vector<1x32x1024xf32>
    %74 = vector.shape_cast %73 : vector<1x32x1024xf32> to vector<32x1024xf32>
    %75 = vector.shape_cast %72 : vector<32x1024xf32> to vector<1x32x1024xf32>
    tpu.vector_store %arg9[%c1_48, %c0_49, %c0_50], %75 {strides = array<i32>} : memref<2x32x1024xf32, #tpu.memory_space<vmem>>, vector<1x32x1024xf32>,
    return
  }
  func.func @transform_0(%arg0: i32) -> (i32, i32, i32) {
    %c0_i32 = arith.constant 0 : i32
    %c0_i32_0 = arith.constant 0 : i32
    %c0_i32_1 = arith.constant 0 : i32
    return %arg0, %c0_i32, %c0_i32_0 : i32, i32, i32
  }
  func.func @transform_1(%arg0: i32) -> (i32, i32, i32) {
    %c0_i32 = arith.constant 0 : i32
    %c0_i32_0 = arith.constant 0 : i32
    %c0_i32_1 = arith.constant 0 : i32
    return %arg0, %c0_i32, %c0_i32_0 : i32, i32, i32
  }
  func.func @transform_2(%arg0: i32) -> (i32, i32) {
    %c0_i32 = arith.constant 0 : i32
    %c0_i32_0 = arith.constant 0 : i32
    %c0_i32_1 = arith.constant 0 : i32
    return %c0_i32, %c0_i32_0 : i32, i32
  }
  func.func @transform_3(%arg0: i32) -> (i32, i32) {
    %c0_i32 = arith.constant 0 : i32
    %c0_i32_0 = arith.constant 0 : i32
    %c0_i32_1 = arith.constant 0 : i32
    return %c0_i32, %c0_i32_0 : i32, i32
  }
  func.func @transform_4(%arg0: i32) -> (i32, i32) {
    %c0_i32 = arith.constant 0 : i32
    %c0_i32_0 = arith.constant 0 : i32
    %c0_i32_1 = arith.constant 0 : i32
    return %c0_i32, %c0_i32_0 : i32, i32
  }
  func.func @transform_5(%arg0: i32) -> (i32, i32) {
    %c0_i32 = arith.constant 0 : i32
    %c0_i32_0 = arith.constant 0 : i32
    %c0_i32_1 = arith.constant 0 : i32
    return %c0_i32, %c0_i32_0 : i32, i32
  }
  func.func @transform_6(%arg0: i32) -> (i32, i32) {
    %c0_i32 = arith.constant 0 : i32
    %c0_i32_0 = arith.constant 0 : i32
    %c0_i32_1 = arith.constant 0 : i32
    return %c0_i32, %c0_i32_0 : i32, i32
  }
  func.func @transform_7(%arg0: i32) -> (i32, i32) {
    %c0_i32 = arith.constant 0 : i32
    %c0_i32_0 = arith.constant 0 : i32
    %c0_i32_1 = arith.constant 0 : i32
    return %c0_i32, %c0_i32_0 : i32, i32
  }
  func.func @transform_8(%arg0: i32) -> (i32, i32, i32) {
    %c0_i32 = arith.constant 0 : i32
    %c0_i32_0 = arith.constant 0 : i32
    %c0_i32_1 = arith.constant 0 : i32
    return %arg0, %c0_i32, %c0_i32_0 : i32, i32, i32
  }
}

</mosaic_0001>

<bundles_post_ra>
// kernel: tpu_custom_call.1
= control target key start
LH: loop header
LB: loop body
LE: loop exit
PB: predicated region body
PF: predicated region fallthrough
CT: control target
= control target key end

     0   :  { %13 = vsyncpa [#allocation3], 0  ;;  %s3879_s0 = inlined_call_operand.hbm [shape: f32[2,32,1024], index: 0, kind: input, shape index: {}]   ;;  %s3880_s1 = inlined_call_operand.hbm [shape: f32[2,32,1024], index: 1, kind: input, shape index: {}]   ;;  %s3881_s2 = inlined_call_operand.hbm [shape: f32[32,128], index: 2, kind: input, shape index: {}]   ;;  %s3882_s3 = inlined_call_operand.hbm [shape: f32[32,1], index: 3, kind: input, shape index: {}]   ;;  %s3883_s4 = inlined_call_operand.hbm [shape: f32[2,32], index: 4, kind: input, shape index: {}]   ;;  %s3884_s5 = inlined_call_operand.hbm [shape: f32[2,1], index: 5, kind: input, shape index: {}]   ;;  %s3885_s6 = inlined_call_operand.hbm [shape: f32[32,2], index: 6, kind: input, shape index: {}]   ;;  %s3886_s7 = inlined_call_operand.hbm [shape: f32[32,1], index: 7, kind: input, shape index: {}]   ;;  %s3887_s8 = inlined_call_operand.hbm [shape: f32[2,32,1024], index: 8, kind: output, shape index: {}]  }
   0x1   :  { %14 = vsyncpa [#allocation6], 0 }
   0x2   :  { %15 = vsyncpa [#allocation9], 0 }
   0x3   :  { %16 = vsyncpa [#allocation12], 0 }
   0x4   :  { %17 = vsyncpa [#allocation15], 0 }
   0x5   :  { %18 = vsyncpa [#allocation4], 0  ;;  %s2447_s27 = smov [#allocation5]   ;;  %s2237_s9 = scalar_lea.hbm %s3880_s1, 8192 }
   0x6   :  { %s36_s28 = sshll.u32 %s2447_s27, 4  ;;  %p2238_p0 = scmp.ne.s32.totalorder %s3880_s1, %s2237_s9  ;;  %s37_s28 = int_to_ptr.vmem [resolvable:$true] %s36_s28 }
   0x7   :  { %p2241_p1 = scmp.lt.u32.totalorder %s2237_s9, %s3880_s1 }
   0x9   :  { %p2243_p2 = pnand %p2241_p1, %p2238_p0 }
   0xb   :  { %2246 = shalt.err (!%p2243_p2)
}
   0xc   :  { %s2247_s14 = scalar_lea.vmem %s37_s28, 8192  ;;  %p2252_p4 = scmp.lt.s32.totalorder %s37_s28, %s37_s28 }
   0xd   :  { %p2248_p3 = scmp.ne.s32.totalorder %s37_s28, %s2247_s14  ;;  %p2253_p5 = scmp.lt.s32.totalorder %s2247_s14, %s2247_s14 }
   0xf   :  { %p2254_p6 = por %p2253_p5, %p2252_p4 }
  0x11   :  { %p2255_p7 = pnand %p2254_p6, %p2248_p3 }
  0x13   :  { %2258 = shalt.err (!%p2255_p7)
}
  0x14   :  { %s2448_s15 = smov 1024   ;;  %s2449_s16 = smov 64  }
  0x15   :  { %42 = dma.hbm_to_vmem [thread:$0]  %s3880_s1, 8192, %s37_s28, [#allocation6], %s2448_s15, %s2448_s15, %s2449_s16  }
  0x16   :  { %s2450_s19 = smov [#allocation8]   ;;  %s2451_s21 = smov [#allocation11]  }
  0x17   :  { %s60_s20 = sshll.u32 %s2450_s19, 4  ;;  %s83_s22 = sshll.u32 %s2451_s21, 4  ;;  %s61_s20 = int_to_ptr.vmem [resolvable:$true] %s60_s20  ;;  %s84_s22 = int_to_ptr.vmem [resolvable:$true] %s83_s22 }
  0x18   :  { %s2259_s25 = scalar_lea.hbm %s3882_s3, 512 }
  0x19   :  { %p2260_p8 = scmp.ne.s32.totalorder %s3882_s3, %s2259_s25  ;;  %p2263_p9 = scmp.lt.u32.totalorder %s2259_s25, %s3882_s3 }
  0x1b   :  { %p2265_p10 = pnand %p2263_p9, %p2260_p8 }
  0x1d   :  { %2268 = shalt.err (!%p2265_p10)
}
  0x1e   :  { %s2269_s1 = scalar_lea.vmem %s61_s20, 512  ;;  %p2274_p12 = scmp.lt.s32.totalorder %s61_s20, %s61_s20 }
  0x1f   :  { %p2270_p11 = scmp.ne.s32.totalorder %s61_s20, %s2269_s1  ;;  %p2275_p13 = scmp.lt.s32.totalorder %s2269_s1, %s2269_s1 }
  0x21   :  { %p2276_p0 = por %p2275_p13, %p2274_p12 }
  0x23   :  { %p2277_p1 = pnand %p2276_p0, %p2270_p11 }
  0x25   :  { %2280 = shalt.err (!%p2277_p1)
}
  0x26   :  { %s2452_s28 = smov 128   ;;  %s2453_s9 = smov 8  }
  0x27   :  { %66 = dma.hbm_to_vmem [thread:$0]  %s3882_s3, 512, %s61_s20, [#allocation9], %s2452_s28, %s2452_s28, %s2453_s9  }
  0x28   :  { %s2281_s14 = scalar_lea.hbm %s3884_s5, 32 }
  0x29   :  { %p2282_p2 = scmp.ne.s32.totalorder %s3884_s5, %s2281_s14  ;;  %p2285_p3 = scmp.lt.u32.totalorder %s2281_s14, %s3884_s5 }
  0x2b   :  { %p2287_p4 = pnand %p2285_p3, %p2282_p2 }
  0x2d   :  { %2290 = shalt.err (!%p2287_p4)
}
  0x2e   :  { %s2291_s23 = scalar_lea.vmem %s84_s22, 32  ;;  %p2296_p6 = scmp.lt.s32.totalorder %s84_s22, %s84_s22 }
  0x2f   :  { %p2292_p5 = scmp.ne.s32.totalorder %s84_s22, %s2291_s23  ;;  %p2297_p7 = scmp.lt.s32.totalorder %s2291_s23, %s2291_s23 }
  0x31   :  { %p2298_p8 = por %p2297_p7, %p2296_p6 }
  0x33   :  { %p2299_p9 = pnand %p2298_p8, %p2292_p5 }
  0x35   :  { %2302 = shalt.err (!%p2299_p9)
}
  0x36   :  { %86 = dma.hbm_to_vmem [thread:$0]  %s3884_s5, 32, %s84_s22, [#allocation12]  }
  0x37   :  { %s2454_s24 = smov [#allocation2]   ;;  %s2455_s26 = smov [#allocation7]  }
  0x38   :  { %s24_s25 = sshll.u32 %s2454_s24, 4  ;;  %s48_s27 = sshll.u32 %s2455_s26, 4  ;;  %s25_s25 = int_to_ptr.vmem [resolvable:$true] %s24_s25  ;;  %s49_s27 = int_to_ptr.vmem [resolvable:$true] %s48_s27 }
  0x39   :  { %s2303_s1 = scalar_lea.hbm %s3879_s0, 8192 }
  0x3a   :  { %p2304_p10 = scmp.ne.s32.totalorder %s3879_s0, %s2303_s1  ;;  %p2307_p11 = scmp.lt.u32.totalorder %s2303_s1, %s3879_s0 }
  0x3c   :  { %p2309_p12 = pnand %p2307_p11, %p2304_p10 }
  0x3e   :  { %2312 = shalt.err (!%p2309_p12)
}
  0x3f   :  { %s2313_s5 = scalar_lea.vmem %s25_s25, 8192  ;;  %p2318_p0 = scmp.lt.s32.totalorder %s25_s25, %s25_s25 }
  0x40   :  { %p2314_p13 = scmp.ne.s32.totalorder %s25_s25, %s2313_s5  ;;  %p2319_p1 = scmp.lt.s32.totalorder %s2313_s5, %s2313_s5 }
  0x42   :  { %p2320_p2 = por %p2319_p1, %p2318_p0 }
  0x44   :  { %p2321_p3 = pnand %p2320_p2, %p2314_p13 }
  0x46   :  { %2324 = shalt.err (!%p2321_p3)
}
  0x47   :  { %30 = dma.hbm_to_vmem [thread:$0]  %s3879_s0, 8192, %s25_s25, [#allocation3], %s2448_s15, %s2448_s15, %s2449_s16  }
  0x48   :  { %s2325_s19 = scalar_lea.hbm %s3881_s2, 512 }
  0x49   :  { %p2326_p4 = scmp.ne.s32.totalorder %s3881_s2, %s2325_s19  ;;  %p2329_p5 = scmp.lt.u32.totalorder %s2325_s19, %s3881_s2 }
  0x4b   :  { %p2331_p6 = pnand %p2329_p5, %p2326_p4 }
  0x4d   :  { %2334 = shalt.err (!%p2331_p6)
}
  0x4e   :  { %s2335_s24 = scalar_lea.vmem %s49_s27, 512  ;;  %p2340_p8 = scmp.lt.s32.totalorder %s49_s27, %s49_s27 }
  0x4f   :  { %p2336_p7 = scmp.ne.s32.totalorder %s49_s27, %s2335_s24  ;;  %p2341_p9 = scmp.lt.s32.totalorder %s2335_s24, %s2335_s24 }
  0x51   :  { %p2342_p10 = por %p2341_p9, %p2340_p8 }
  0x53   :  { %p2343_p11 = pnand %p2342_p10, %p2336_p7 }
  0x55   :  { %2346 = shalt.err (!%p2343_p11)
}
  0x56   :  { %54 = dma.hbm_to_vmem [thread:$0]  %s3881_s2, 512, %s49_s27, [#allocation6], %s2452_s28, %s2452_s28, %s2453_s9  }
  0x57   :  { %s2456_s26 = smov [#allocation10]   ;;  %s2457_s30 = smov [#allocation13]  }
  0x58   :  { %s73_s29 = sshll.u32 %s2456_s26, 4  ;;  %s92_s1 = sshll.u32 %s2457_s30, 4  ;;  %s74_s29 = int_to_ptr.vmem [resolvable:$true] %s73_s29  ;;  %s93_s1 = int_to_ptr.vmem [resolvable:$true] %s92_s1 }
  0x59   :  { %s2347_s12 = scalar_lea.hbm %s3883_s4, 32 }
  0x5a   :  { %p2348_p12 = scmp.ne.s32.totalorder %s3883_s4, %s2347_s12  ;;  %p2351_p13 = scmp.lt.u32.totalorder %s2347_s12, %s3883_s4 }
  0x5c   :  { %p2353_p0 = pnand %p2351_p13, %p2348_p12 }
  0x5e   :  { %2356 = shalt.err (!%p2353_p0)
}
  0x5f   :  { %s2357_s2 = scalar_lea.vmem %s74_s29, 32  ;;  %p2362_p2 = scmp.lt.s32.totalorder %s74_s29, %s74_s29 }
  0x60   :  { %p2358_p1 = scmp.ne.s32.totalorder %s74_s29, %s2357_s2  ;;  %p2363_p3 = scmp.lt.s32.totalorder %s2357_s2, %s2357_s2 }
  0x62   :  { %p2364_p4 = por %p2363_p3, %p2362_p2 }
  0x64   :  { %p2365_p5 = pnand %p2364_p4, %p2358_p1 }
  0x66   :  { %2368 = shalt.err (!%p2365_p5)
}
  0x67   :  { %76 = dma.hbm_to_vmem [thread:$0]  %s3883_s4, 32, %s74_s29, [#allocation9]  }
  0x68   :  { %s2369_s21 = scalar_lea.hbm %s3885_s6, 512 }
  0x69   :  { %p2370_p6 = scmp.ne.s32.totalorder %s3885_s6, %s2369_s21  ;;  %p2373_p7 = scmp.lt.u32.totalorder %s2369_s21, %s3885_s6 }
  0x6b   :  { %p2375_p8 = pnand %p2373_p7, %p2370_p6 }
  0x6d   :  { %2378 = shalt.err (!%p2375_p8)
}
  0x6e   :  { %s2379_s0 = scalar_lea.vmem %s93_s1, 512  ;;  %p2384_p10 = scmp.lt.s32.totalorder %s93_s1, %s93_s1 }
  0x6f   :  { %p2380_p9 = scmp.ne.s32.totalorder %s93_s1, %s2379_s0  ;;  %p2385_p11 = scmp.lt.s32.totalorder %s2379_s0, %s2379_s0 }
  0x71   :  { %p2386_p12 = por %p2385_p11, %p2384_p10 }
  0x73   :  { %p2387_p13 = pnand %p2386_p12, %p2380_p9 }
  0x75   :  { %2390 = shalt.err (!%p2387_p13)
}
  0x76   :  { %98 = dma.hbm_to_vmem [thread:$0]  %s3885_s6, 512, %s93_s1, [#allocation12], %s2452_s28, %s2452_s28, %s2453_s9  }
  0x77   :  { %s2458_s26 = smov [#allocation14]   ;;  %s2391_s11 = scalar_lea.hbm %s3886_s7, 512 }
  0x78   :  { %s104_s29 = sshll.u32 %s2458_s26, 4  ;;  %p2392_p0 = scmp.ne.s32.totalorder %s3886_s7, %s2391_s11  ;;  %s105_s29 = int_to_ptr.vmem [resolvable:$true] %s104_s29 }
  0x79   :  { %p2395_p1 = scmp.lt.u32.totalorder %s2391_s11, %s3886_s7 }
  0x7b   :  { %p2397_p2 = pnand %p2395_p1, %p2392_p0 }
  0x7d   :  { %2400 = shalt.err (!%p2397_p2)
}
  0x7e   :  { %s2401_s14 = scalar_lea.vmem %s105_s29, 512  ;;  %p2406_p4 = scmp.lt.s32.totalorder %s105_s29, %s105_s29 }
  0x7f   :  { %p2402_p3 = scmp.ne.s32.totalorder %s105_s29, %s2401_s14  ;;  %p2407_p5 = scmp.lt.s32.totalorder %s2401_s14, %s2401_s14 }
  0x81   :  { %p2408_p6 = por %p2407_p5, %p2406_p4 }
  0x83   :  { %p2409_p7 = pnand %p2408_p6, %p2402_p3 }
  0x85   :  { %2412 = shalt.err (!%p2409_p7)
}
  0x86   :  { %110 = dma.hbm_to_vmem [thread:$0]  %s3886_s7, 512, %s105_s29, [#allocation15], %s2452_s28, %s2452_s28, %s2453_s9  }
  0x87   :  { %2435 = dma.done.wait [#allocation3], 8192  }
  0x88   :  { %2436 = vsyncadd [#allocation3], 4294959104 }
  0x89   :  { %2437 = dma.done.wait [#allocation6], 8704  }
  0x8a   :  { %2438 = vsyncadd [#allocation6], 4294958592 }
  0x8b   :  { %2439 = dma.done.wait [#allocation9], 544  }
  0x8c   :  { %2440 = vsyncadd [#allocation9], 4294966752 }
  0x8d   :  { %2441 = dma.done.wait [#allocation12], 544  }
  0x8e   :  { %2442 = vsyncadd [#allocation12], 4294966752 }
  0x8f   :  { %2443 = dma.done.wait [#allocation15], 512  }
  0x90   :  { %2444 = vsyncadd [#allocation15], 4294966784  ;;  %v3891_v0 = vmov 0.0   ;;  %v3888_v1 = vmov 0   ;;  %v2628_v2 = vld [vmem:[#allocation2 + $0x8] sm:$0xff]  ;;  %v2634_v5 = vld [vmem:[#allocation2 + $0x18] sm:$0xff] }
  0x91   :  { %397 = vmatprep.mubr.f32.mxu0 %v3891_v0  ;;  %486 = vmatprep.mubr.f32.mxu1 %v3891_v0  ;;  %v2630_v3 = vld [vmem:[#allocation2 + $0x48] sm:$0xff]  ;;  %v2636_v6 = vld [vmem:[#allocation2 + $0x58] sm:$0xff]  ;;  %v2640_v8 = vld [vmem:[#allocation2] sm:$0xff]  ;;  %vm2462_vm0 = vmmov 0   ;;  %vm1416_vm1 = vcmask 7168   ;;  %vm1426_vm2 = vcmask 261120  }
  0x92   :  { %2215 = vset.pattern.permute.xlu0 %v3888_v1  ;;  %2216 = vset.pattern.permute.xlu1 %v3888_v1  ;;  %v1935_v4 = vpack.c.bf16 %v2630_v3, %v2628_v2  ;;  %v1967_v7 = vpack.c.bf16 %v2636_v6, %v2634_v5  ;;  %v2642_v9 = vld [vmem:[#allocation5 + $0x8] sm:$0xff]  ;;  %v2644_v10 = vld [vmem:[#allocation2 + $0x40] sm:$0xff]  ;;  %v2648_v12 = vld [vmem:[#allocation2 + $0x10] sm:$0xff]  ;;  %vm1521_vm3 = vcmask 15360   ;;  %vm1534_vm4 = vcmask 1041408   ;;  %s2464_s7 = smov [#allocation16]  }
  0x93   :  { %v2646_v11 = vld [vmem:[#allocation5 + $0x48] sm:$0xff]  ;;  %v2650_v13 = vld [vmem:[#allocation2 + $0x50] sm:$0xff]  ;;  %v218_v14 = vsub.f32 %v2628_v2, %v2642_v9  ;;  %v2656_v16 = vld [vmem:[#allocation5 + $0x18] sm:$0xff]  ;;  %v1937_v18 = vpack.c.bf16 %v2644_v10, %v2640_v8  ;;  %s1880_s28 = sshll.u32 %s2464_s7, 4  ;;  %s1881_s28 = int_to_ptr.vmem [resolvable:$true] %s1880_s28 }
  0x94   :  { %1936 = vmatprep.subr.bf16.mxu0 %v1935_v4  ;;  %1968 = vmatprep.subr.bf16.mxu1 %v1967_v7  ;;  %v226_v15 = vsub.f32 %v2630_v3, %v2646_v11  ;;  %v2658_v17 = vld [vmem:[#allocation5 + $0x58] sm:$0xff]  ;;  %v2662_v19 = vld [vmem:[#allocation2 + $0x88] sm:$0xff]  ;;  %v2664_v20 = vld [vmem:[#allocation5] sm:$0xff]  ;;  %v1969_v22 = vpack.c.bf16 %v2650_v13, %v2648_v12  ;;  %v220_v26 = vsub.f32 %v2634_v5, %v2656_v16  ;;  %s2413_s9 = scalar_lea.vmem %s1881_s28, 8192  ;;  %p2418_p9 = scmp.lt.s32.totalorder %s1881_s28, %s1881_s28 }
  0x95   :  { %v2666_v21 = vld [vmem:[#allocation5 + $0x40] sm:$0xff]  ;;  %v2670_v23 = vld [vmem:[#allocation2 + $0xc8] sm:$0xff]  ;;  %v2672_v24 = vld [vmem:[#allocation2 + $0x98] sm:$0xff]  ;;  %1938 = vmatpush1.bf16.msra.mxu0 %v1937_v18  ;;  %v228_v32 = vsub.f32 %v2636_v6, %v2658_v17  ;;  %v1943_v37 = vpack.c.bf16 %v2646_v11, %v2642_v9  ;;  %v250_v38 = vand.u32 2147483647, %v218_v14  ;;  %v1975_v41 = vpack.c.bf16 %v2658_v17, %v2656_v16  ;;  %p2414_p8 = scmp.ne.s32.totalorder %s1881_s28, %s2413_s9  ;;  %p2419_p10 = scmp.lt.s32.totalorder %s2413_s9, %s2413_s9 }
  0x96   :  { %v2674_v25 = vld [vmem:[#allocation2 + $0xd8] sm:$0xff]  ;;  %v1939_v27 = vpack.c.bf16 %v2670_v23, %v2662_v19  ;;  %v2682_v29 = vld [vmem:[#allocation2 + $0x80] sm:$0xff]  ;;  %v2686_v31 = vld [vmem:[#allocation2 + $0x90] sm:$0xff]  ;;  %1970 = vmatpush1.bf16.msra.mxu1 %v1969_v22  ;;  %v258_v39 = vand.u32 2147483647, %v226_v15  ;;  %v217_v44 = vsub.f32 %v2640_v8, %v2664_v20  ;;  %v225_v45 = vsub.f32 %v2644_v10, %v2666_v21 }
  0x97   :  { %v1971_v28 = vpack.c.bf16 %v2674_v25, %v2672_v24  ;;  %v2684_v30 = vld [vmem:[#allocation2 + $0xc0] sm:$0xff]  ;;  %v2690_v33 = vld [vmem:[#allocation5 + $0x10] sm:$0xff]  ;;  %v2704_v42 = vld [vmem:[#allocation5 + $0x88] sm:$0xff]  ;;  %v252_v49 = vand.u32 2147483647, %v220_v26  ;;  %v1945_v51 = vpack.c.bf16 %v2666_v21, %v2664_v20  ;;  %p2420_p11 = por %p2419_p10, %p2418_p9 }
  0x98   :  { %v2692_v34 = vld [vmem:[#allocation5 + $0x50] sm:$0xff]  ;;  %v1941_v35 = vpack.c.bf16 %v2684_v30, %v2682_v29  ;;  %1940 = vmatprep.subr.bf16.mxu0 %v1939_v27  ;;  %v2706_v43 = vld [vmem:[#allocation5 + $0xc8] sm:$0xff]  ;;  %v219_v46 = vsub.f32 %v2648_v12, %v2690_v33  ;;  %v2714_v47 = vld [vmem:[#allocation5 + $0x98] sm:$0xff]  ;;  %v260_v55 = vand.u32 2147483647, %v228_v32  ;;  %v234_v59 = vsub.f32 %v2662_v19, %v2704_v42 }
  0x99   :  { %v2696_v36 = vld [vmem:[#allocation2 + $0xd0] sm:$0xff]  ;;  %1972 = vmatprep.subr.bf16.mxu1 %v1971_v28  ;;  %v2716_v48 = vld [vmem:[#allocation5 + $0xd8] sm:$0xff]  ;;  %v227_v50 = vsub.f32 %v2650_v13, %v2692_v34  ;;  %v1977_v52 = vpack.c.bf16 %v2692_v34, %v2690_v33  ;;  %v2724_v53 = vld [vmem:[#allocation5 + $0x80] sm:$0xff]  ;;  %v1947_v56 = vpack.c.bf16 %v2706_v43, %v2704_v42  ;;  %v242_v60 = vsub.f32 %v2670_v23, %v2706_v43  ;;  %p2421_p12 = pnand %p2420_p11, %p2414_p8 }
  0x9a   :  { %v1973_v40 = vpack.c.bf16 %v2696_v36, %v2686_v31  ;;  %1942 = vmatpush1.bf16.msra.mxu0 %v1941_v35  ;;  %v2726_v54 = vld [vmem:[#allocation5 + $0xc0] sm:$0xff]  ;;  %v2730_v57 = vld [vmem:[#allocation5 + $0x90] sm:$0xff]  ;;  %v1979_v61 = vpack.c.bf16 %v2716_v48, %v2714_v47  ;;  %v1951_v62 = vpack.c.bf16 %v258_v39, %v250_v38  ;;  %v236_v63 = vsub.f32 %v2672_v24, %v2714_v47 }
  0x9b   :  { %1944 = vmatprep.subr.bf16.mxu0 %v1943_v37  ;;  %v2732_v58 = vld [vmem:[#allocation5 + $0xd0] sm:$0xff]  ;;  %v244_v4 = vsub.f32 %v2674_v25, %v2716_v48  ;;  %v1949_v7 = vpack.c.bf16 %v2726_v54, %v2724_v53  ;;  %v249_v14 = vand.u32 2147483647, %v217_v44  ;;  %v257_v15 = vand.u32 2147483647, %v225_v45 }
  0x9c   :  { %1974 = vmatpush1.bf16.msra.mxu1 %v1973_v40  ;;  %v251_v18 = vand.u32 2147483647, %v219_v46  ;;  %v1981_v22 = vpack.c.bf16 %v2732_v58, %v2730_v57  ;;  %v259_v26 = vand.u32 2147483647, %v227_v50  ;;  %v233_v27 = vsub.f32 %v2682_v29, %v2724_v53 }
  0x9d   :  { %1976 = vmatprep.subr.bf16.mxu1 %v1975_v41  ;;  %v241_v28 = vsub.f32 %v2684_v30, %v2726_v54  ;;  %v266_v32 = vand.u32 2147483647, %v234_v59  ;;  %v274_v35 = vand.u32 2147483647, %v242_v60  ;;  %v235_v37 = vsub.f32 %v2686_v31, %v2730_v57 }
  0x9e   :  { %1946 = vmatpush1.bf16.msra.mxu0 %v1945_v51  ;;  %v243_v38 = vsub.f32 %v2696_v36, %v2732_v58  ;;  %v1983_v39 = vpack.c.bf16 %v260_v55, %v252_v49  ;;  %v268_v40 = vand.u32 2147483647, %v236_v63  ;;  %v276_v41 = vand.u32 2147483647, %v244_v4  ;;  %v2810_v63 = vld [vmem:[#allocation2 + $0xa8] sm:$0xff] }
  0x9f   :  { %1948 = vmatprep.subr.bf16.mxu0 %v1947_v56  ;;  %v282_v44 = vmul.f32 %v2642_v9, %v2628_v2  ;;  %v290_v45 = vmul.f32 %v2646_v11, %v2630_v3  ;;  %v1953_v46 = vpack.c.bf16 %v257_v15, %v249_v14  ;;  %v265_v50 = vand.u32 2147483647, %v233_v27  ;;  %v2812_v4 = vld [vmem:[#allocation2 + $0xe8] sm:$0xff]  ;;  %v2816_v14 = vld [vmem:[#allocation2 + $0xf8] sm:$0xff]  ;;  %v2818_v15 = vld [vmem:[#allocation2 + $0xa0] sm:$0xff] }
  0xa0   :  { %1978 = vmatpush1.bf16.msra.mxu1 %v1977_v52  ;;  %v273_v51 = vand.u32 2147483647, %v241_v28  ;;  %v1985_v52 = vpack.c.bf16 %v259_v26, %v251_v18  ;;  %v1955_v56 = vpack.c.bf16 %v274_v35, %v266_v32  ;;  %v267_v59 = vand.u32 2147483647, %v235_v37  ;;  %v2820_v18 = vld [vmem:[#allocation2 + $0xe0] sm:$0xff]  ;;  %v2824_v26 = vld [vmem:[#allocation2 + $0xb0] sm:$0xff] }
  0xa1   :  { %1980 = vmatprep.subr.bf16.mxu1 %v1979_v61  ;;  %v275_v60 = vand.u32 2147483647, %v243_v38  ;;  %v284_v49 = vmul.f32 %v2656_v16, %v2634_v5  ;;  %v292_v55 = vmul.f32 %v2658_v17, %v2636_v6  ;;  %v1987_v2 = vpack.c.bf16 %v276_v41, %v268_v40  ;;  %v2826_v27 = vld [vmem:[#allocation2 + $0xf0] sm:$0xff]  ;;  %v2828_v28 = vld [vmem:[#allocation5 + $0x28] sm:$0xff]  ;;  %v2836_v38 = vld [vmem:[#allocation5 + $0x38] sm:$0xff] }
  0xa2   :  { %1950 = vmatpush1.bf16.msra.mxu0 %v1949_v7  ;;  %v1959_v9 = vpack.c.bf16 %v290_v45, %v282_v44  ;;  %v281_v3 = vmul.f32 %v2664_v20, %v2640_v8  ;;  %v1957_v11 = vpack.c.bf16 %v273_v51, %v265_v50  ;;  %v289_v61 = vmul.f32 %v2666_v21, %v2644_v10  ;;  %v2814_v7 = vld [vmem:[#allocation2 + $0xb8] sm:$0xff]  ;;  %v2834_v37 = vld [vmem:[#allocation5 + $0x68] sm:$0xff]  ;;  %v2842_v41 = vld [vmem:[#allocation5 + $0x20] sm:$0xff] }
  0xa3   :  { %1952 = vmatprep.subr.bf16.mxu0 %v1951_v62  ;;  %v283_v62 = vmul.f32 %v2690_v33, %v2648_v12  ;;  %v291_v5 = vmul.f32 %v2692_v34, %v2650_v13  ;;  %v1989_v6 = vpack.c.bf16 %v275_v60, %v267_v59  ;;  %v298_v16 = vmul.f32 %v2704_v42, %v2662_v19  ;;  %v2788_v34 = vld [vmem:[#allocation2 + $0x28] sm:$0xff]  ;;  %v2844_v44 = vld [vmem:[#allocation5 + $0x60] sm:$0xff]  ;;  %v2846_v45 = vld [vmem:[#allocation5 + $0x30] sm:$0xff] }
  0xa4   :  { %1982 = vmatpush1.bf16.msra.mxu1 %v1981_v22  ;;  %v306_v8 = vmul.f32 %v2706_v43, %v2670_v23  ;;  %v1991_v17 = vpack.c.bf16 %v292_v55, %v284_v49  ;;  %v300_v10 = vmul.f32 %v2714_v47, %v2672_v24  ;;  %v308_v12 = vmul.f32 %v2716_v48, %v2674_v25  ;;  %v2790_v42 = vld [vmem:[#allocation2 + $0x68] sm:$0xff]  ;;  %v2792_v43 = vld [vmem:[#allocation2 + $0x38] sm:$0xff]  ;;  %v2796_v47 = vld [vmem:[#allocation2 + $0x20] sm:$0xff] }
  0xa5   :  { %1984 = vmatprep.subr.bf16.mxu1 %v1983_v39  ;;  %v1961_v20 = vpack.c.bf16 %v289_v61, %v281_v3  ;;  %v1993_v13 = vpack.c.bf16 %v291_v5, %v283_v62  ;;  %v297_v21 = vmul.f32 %v2724_v53, %v2682_v29  ;;  %v305_v19 = vmul.f32 %v2726_v54, %v2684_v30  ;;  %v2794_v29 = vld [vmem:[#allocation2 + $0x78] sm:$0xff]  ;;  %v2800_v48 = vld [vmem:[#allocation2 + $0x60] sm:$0xff]  ;;  %v2802_v53 = vld [vmem:[#allocation2 + $0x30] sm:$0xff] }
  0xa6   :  { %1954 = vmatpush1.bf16.msra.mxu0 %v1953_v46  ;;  %v1963_v23 = vpack.c.bf16 %v306_v8, %v298_v16  ;;  %v299_v33 = vmul.f32 %v2730_v57, %v2686_v31  ;;  %v307_v24 = vmul.f32 %v2732_v58, %v2696_v36  ;;  %v1995_v25 = vpack.c.bf16 %v308_v12, %v300_v10  ;;  %v2804_v54 = vld [vmem:[#allocation2 + $0x70] sm:$0xff]  ;;  %v2806_v57 = vld [vmem:[#allocation7] sm:$0xff]  ;;  %v2838_v39 = vld [vmem:[#allocation5 + $0x78] sm:$0xff] }
  0xa7   :  { %1956 = vmatprep.subr.bf16.mxu0 %v1955_v56  ;;  %v1965_v30 = vpack.c.bf16 %v305_v19, %v297_v21  ;;  %v1999_v36 = vpack.c.bf16 %v2790_v42, %v2788_v34  ;;  %3970 = vst [vmem:[#allocation23_spill] sm:$0xff] %v2806_v57  ;;  %v2031_v58 = vpack.c.bf16 %v2794_v29, %v2792_v43  ;;  %v2849_v46 = vld [vmem:[#allocation5 + $0x70] sm:$0xff]  ;;  %v2851_v50 = vld [vmem:[#allocation5 + $0xa8] sm:$0xff]  ;;  %v2862_v60 = vld [vmem:[#allocation5 + $0xb8] sm:$0xff] }
  0xa8   :  { %1986 = vmatpush1.bf16.msra.mxu1 %v1985_v52  ;;  %v1997_v31 = vpack.c.bf16 %v307_v24, %v299_v33  ;;  %v2001_v22 = vpack.c.bf16 %v2800_v48, %v2796_v47  ;;  %v2033_v32 = vpack.c.bf16 %v2804_v54, %v2802_v53  ;;  %v2003_v35 = vpack.c.bf16 %v2812_v4, %v2810_v63  ;;  %v2853_v51 = vld [vmem:[#allocation5 + $0xe8] sm:$0xff]  ;;  %v2864_v49 = vld [vmem:[#allocation5 + $0xf8] sm:$0xff]  ;;  %v2878_v62 = vld [vmem:[#allocation5 + $0xa0] sm:$0xff] }
  0xa9   :  { %1988 = vmatprep.subr.bf16.mxu1 %v1987_v2  ;;  %v2035_v40 = vpack.c.bf16 %v2816_v14, %v2814_v7  ;;  %v222_v52 = vsub.f32 %v2788_v34, %v2828_v28  ;;  %v2005_v56 = vpack.c.bf16 %v2820_v18, %v2818_v15  ;;  %v2037_v59 = vpack.c.bf16 %v2826_v27, %v2824_v26  ;;  %v2868_v2 = vld [vmem:[#allocation7 + $0x8] sm:$0xff]  ;;  %v2880_v5 = vld [vmem:[#allocation5 + $0xe0] sm:$0xff]  ;;  %v2906_v24 = vld [vmem:[#allocation7 + $0x10] sm:$0xff] }
  0xaa   :  { %1958 = vmatpush1.bf16.msra.mxu0 %v1957_v11  ;;  %v230_v55 = vsub.f32 %v2790_v42, %v2834_v37  ;;  %3971 = vst [vmem:[#allocation24_spill] sm:$0xff] %v2868_v2  ;;  %v2039_v3 = vpack.c.bf16 %v2838_v39, %v2836_v38  ;;  %v2009_v11 = vpack.c.bf16 %v2844_v44, %v2842_v41 }
  0xab   :  { %1960 = vmatprep.subr.bf16.mxu0 %v1959_v9  ;;  %v2007_v9 = vpack.c.bf16 %v2834_v37, %v2828_v28  ;;  %v2041_v61 = vpack.c.bf16 %v2849_v46, %v2846_v45  ;;  %v232_v16 = vsub.f32 %v2794_v29, %v2838_v39  ;;  %v2011_v8 = vpack.c.bf16 %v2853_v51, %v2851_v50 }
  0xac   :  { %1990 = vmatpush1.bf16.msra.mxu1 %v1989_v6  ;;  %v224_v6 = vsub.f32 %v2792_v43, %v2836_v38  ;;  %v254_v10 = vand.u32 2147483647, %v222_v52  ;;  %v221_v12 = vsub.f32 %v2796_v47, %v2842_v41  ;;  %v262_v21 = vand.u32 2147483647, %v230_v55 }
  0xad   :  { %1992 = vmatprep.subr.bf16.mxu1 %v1991_v17  ;;  %v2043_v17 = vpack.c.bf16 %v2864_v49, %v2862_v60  ;;  %v229_v19 = vsub.f32 %v2800_v48, %v2844_v44  ;;  %v231_v33 = vsub.f32 %v2804_v54, %v2849_v46  ;;  %v237_v52 = vsub.f32 %v2818_v15, %v2878_v62 }
  0xae   :  { %1962 = vmatpush1.bf16.msra.mxu0 %v1961_v20  ;;  %v2895_v20 = vld [vmem:[#allocation5 + $0xb0] sm:$0xff]  ;;  %v2015_v55 = vpack.c.bf16 %v262_v21, %v254_v10  ;;  %v3972_v10 = vmov 0.0  }
  0xaf   :  { %1964 = vmatprep.subr.bf16.mxu0 %v1963_v23  ;;  %v223_v23 = vsub.f32 %v2802_v53, %v2846_v45  ;;  %v239_v1 = vsub.f32 %v2824_v26, %v2895_v20  ;;  %v269_v21 = vand.u32 2147483647, %v237_v52  ;;  %v3000_v52 = vld [vmem:[#allocation2 + $0x180] sm:$0xff] }
  0xb0   :  { %1994 = vmatpush1.bf16.msra.mxu1 %v1993_v13  ;;  %v2897_v13 = vld [vmem:[#allocation5 + $0xf0] sm:$0xff] }
  0xb1   :  { %1996 = vmatprep.subr.bf16.mxu1 %v1995_v25  ;;  %v2013_v25 = vpack.c.bf16 %v2880_v5, %v2878_v62 }
  0xb2   :  { %1966 = vmatpush1.bf16.msra.mxu0 %v1965_v30  ;;  %v238_v30 = vsub.f32 %v2810_v63, %v2851_v50 }
  0xb3   :  { %2000 = vmatprep.subr.bf16.mxu0 %v1999_v36  ;;  %v256_v36 = vand.u32 2147483647, %v224_v6  ;;  %v263_v6 = vand.u32 2147483647, %v231_v33 }
  0xb4   :  { %1998 = vmatpush1.bf16.msra.mxu1 %v1997_v31  ;;  %v246_v31 = vsub.f32 %v2812_v4, %v2853_v51 }
  0xb5   :  { %2032 = vmatprep.subr.bf16.mxu1 %v2031_v58  ;;  %398 = vmatmul.mubr.f32.vlgmr.msra.gmra.mrb[0].mxu0 %v2806_v57  ;;  %v264_v58 = vand.u32 2147483647, %v232_v16  ;;  %v270_v16 = vand.u32 2147483647, %v238_v30 }
  0xb6   :  { %2002 = vmatpush1.bf16.msra.mxu0 %v2001_v22  ;;  %403 = vmatprep.mubr.f32.mxu0 %v3891_v0  ;;  %v240_v22 = vsub.f32 %v2814_v7, %v2862_v60 }
  0xb7   :  { %487 = vmatmul.mubr.f32.vlgmr.msra.gmra.mrb[0].mxu1 %v2806_v57  ;;  %2004 = vmatprep.subr.bf16.mxu0 %v2003_v35  ;;  %v2045_v35 = vpack.c.bf16 %v2897_v13, %v2895_v20 }
  0xb8   :  { %2034 = vmatpush1.bf16.msra.mxu1 %v2033_v32  ;;  %492 = vmatprep.mubr.f32.mxu1 %v3891_v0  ;;  %v248_v32 = vsub.f32 %v2816_v14, %v2864_v49  ;;  %v272_v57 = vand.u32 2147483647, %v240_v22  ;;  %v285_v22 = vmul.f32 %v2842_v41, %v2796_v47  ;;  %v302_v47 = vmul.f32 %v2851_v50, %v2810_v63  ;;  %v2972_v50 = vld [vmem:[#allocation2 + $0x108] sm:$0xff] }
  0xb9   :  { %2036 = vmatprep.subr.bf16.mxu1 %v2035_v40  ;;  %404 = vmatmul.mubr.f32.gmra.mrb[2].mxu0 %v2868_v2  ;;  %v253_v40 = vand.u32 2147483647, %v221_v12  ;;  %v278_v12 = vand.u32 2147483647, %v246_v31  ;;  %v271_v31 = vand.u32 2147483647, %v239_v1  ;;  %v287_v1 = vmul.f32 %v2846_v45, %v2802_v53 }
  0xba   :  { %2006 = vmatpush1.bf16.msra.mxu0 %v2005_v56  ;;  %409 = vmatprep.mubr.f32.mxu0 %v3891_v0  ;;  %v245_v56 = vsub.f32 %v2820_v18, %v2880_v5  ;;  %v312_v53 = vmul.f32 %v2864_v49, %v2816_v14  ;;  %v309_v63 = vmul.f32 %v2880_v5, %v2820_v18  ;;  %v142_v45 = vld [vmem:[#allocation8 + $0x18] sm:$0xff] }
  0xbb   :  { %493 = vmatmul.mubr.f32.gmra.mrb[2].mxu1 %v2868_v2  ;;  %2008 = vmatprep.subr.bf16.mxu0 %v2007_v9  ;;  %v261_v9 = vand.u32 2147483647, %v229_v19  ;;  %v247_v2 = vsub.f32 %v2826_v27, %v2897_v13  ;;  %v2019_v30 = vpack.c.bf16 %v278_v12, %v270_v16  ;;  %v311_v14 = vmul.f32 %v2897_v13, %v2826_v27  ;;  %v2982_v27 = vld [vmem:[#allocation2 + $0x100] sm:$0xff]  ;;  %v2992_v13 = vld [vmem:[#allocation2 + $0x188] sm:$0xff] }
  0xbc   :  { %2038 = vmatpush1.bf16.msra.mxu1 %v2037_v59  ;;  %498 = vmatprep.mubr.f32.mxu1 %v3891_v0  ;;  %v2927_v59 = vld [vmem:[#allocation7 + $0x18] sm:$0xff]  ;;  %v2047_v0 = vpack.c.bf16 %v264_v58, %v256_v36  ;;  %v277_v19 = vand.u32 2147483647, %v245_v56  ;;  %v141_v58 = vld [vmem:[#allocation8 + $0x10] sm:$0xff]  ;;  %v3012_v16 = vld [vmem:[#allocation5 + $0x108] sm:$0xff] }
  0xbd   :  { %2040 = vmatprep.subr.bf16.mxu1 %v2039_v3  ;;  %410 = vmatmul.mubr.f32.gmra.mrb[4].mxu0 %v2906_v24  ;;  %v255_v3 = vand.u32 2147483647, %v223_v23  ;;  %v2017_v23 = vpack.c.bf16 %v261_v9, %v253_v40  ;;  %v279_v36 = vand.u32 2147483647, %v247_v2  ;;  %v2984_v2 = vld [vmem:[#allocation2 + $0x140] sm:$0xff]  ;;  %v2998_v40 = vld [vmem:[#allocation2 + $0x1d8] sm:$0xff] }
  0xbe   :  { %2010 = vmatpush1.bf16.msra.mxu0 %v2009_v11  ;;  %v280_v11 = vand.u32 2147483647, %v248_v32  ;;  %415 = vmatprep.mubr.f32.mxu0 %v3972_v10  ;;  %v2994_v32 = vld [vmem:[#allocation2 + $0x1c8] sm:$0xff]  ;;  %v2065_v56 = vpack.c.bf16 %v2984_v2, %v2982_v27  ;;  %v3006_v9 = vld [vmem:[#allocation2 + $0x190] sm:$0xff] }
  0xbf   :  { %499 = vmatmul.mubr.f32.gmra.mrb[4].mxu1 %v2906_v24  ;;  %2012 = vmatprep.subr.bf16.mxu0 %v2011_v8  ;;  %v294_v8 = vmul.f32 %v2834_v37, %v2790_v42  ;;  %v2049_v33 = vpack.c.bf16 %v263_v6, %v255_v3  ;;  %v288_v42 = vmul.f32 %v2836_v38, %v2792_v43  ;;  %v3008_v3 = vld [vmem:[#allocation2 + $0x1d0] sm:$0xff]  ;;  %v3014_v12 = vld [vmem:[#allocation5 + $0x148] sm:$0xff] }
  0xc0   :  { %2042 = vmatpush1.bf16.msra.mxu1 %v2041_v61  ;;  %v286_v61 = vmul.f32 %v2828_v28, %v2788_v34  ;;  %504 = vmatprep.mubr.f32.mxu1 %v3972_v10  ;;  %v2051_v34 = vpack.c.bf16 %v280_v11, %v272_v57  ;;  %v296_v28 = vmul.f32 %v2838_v39, %v2794_v29  ;;  %v140_v29 = vld [vmem:[#allocation8 + $0x8] sm:$0xff]  ;;  %v3016_v11 = vld [vmem:[#allocation5 + $0x118] sm:$0xff] }
  0xc1   :  { %2044 = vmatprep.subr.bf16.mxu1 %v2043_v17  ;;  %416 = vmatmul.mubr.f32.gmra.mrb[6].mxu0 %v2927_v59  ;;  %v139_v17 = vld [vmem:[#allocation8] sm:$0xff]  ;;  %v2021_v37 = vpack.c.bf16 %v277_v19, %v269_v21  ;;  %v295_v43 = vmul.f32 %v2849_v46, %v2804_v54  ;;  %v2053_v57 = vpack.c.bf16 %v279_v36, %v271_v31  ;;  %v3033_v31 = vld [vmem:[#allocation5 + $0x188] sm:$0xff] }
  0xc2   :  { %2014 = vmatpush1.bf16.msra.mxu0 %v2013_v25  ;;  %575 = vmatprep.mubr.f32.mxu0 %v3972_v10  ;;  %v2023_v25 = vpack.c.bf16 %v294_v8, %v286_v61  ;;  %v310_v38 = vmul.f32 %v2853_v51, %v2812_v4  ;;  %v2055_v39 = vpack.c.bf16 %v296_v28, %v288_v42  ;;  %v2974_v51 = vld [vmem:[#allocation2 + $0x148] sm:$0xff]  ;;  %v3022_v61 = vld [vmem:[#allocation5 + $0x158] sm:$0xff]  ;;  %v3024_v8 = vld [vmem:[#allocation5 + $0x100] sm:$0xff] }
  0xc3   :  { %505 = vmatmul.mubr.f32.gmra.mrb[6].mxu1 %v2927_v59  ;;  %2016 = vmatprep.subr.bf16.mxu0 %v2015_v55  ;;  %v2057_v41 = vpack.c.bf16 %v295_v43, %v287_v1  ;;  %v3004_v55 = vld [vmem:[#allocation2 + $0x1c0] sm:$0xff]  ;;  %v2067_v21 = vpack.c.bf16 %v2994_v32, %v2992_v13  ;;  %v860_v36 = vsub.f32 %v2972_v50, %v3012_v16  ;;  %v3042_v42 = vld [vmem:[#allocation5 + $0x1c8] sm:$0xff]  ;;  %v3044_v28 = vld [vmem:[#allocation5 + $0x198] sm:$0xff] }
  0xc4   :  { %2046 = vmatpush1.bf16.msra.mxu1 %v2045_v35  ;;  %664 = vmatprep.mubr.f32.mxu1 %v3972_v10  ;;  %v2027_v4 = vpack.c.bf16 %v310_v38, %v302_v47  ;;  %v2996_v35 = vld [vmem:[#allocation2 + $0x198] sm:$0xff] }
  0xc5   :  { %2048 = vmatprep.subr.bf16.mxu1 %v2047_v0  ;;  %315 = vperm.xlu0 %2215, %v139_v17   ;;  %v293_v0 = vmul.f32 %v2844_v44, %v2800_v48  ;;  %v304_v48 = vmul.f32 %v2862_v60, %v2814_v7  ;;  %v301_v44 = vmul.f32 %v2878_v62, %v2818_v15  ;;  %v2976_v15 = vld [vmem:[#allocation2 + $0x118] sm:$0xff]  ;;  %v2986_v62 = vld [vmem:[#allocation2 + $0x110] sm:$0xff]  ;;  %v3973_v17 = vld [vmem:[#allocation23_spill] sm:$0xff] }
  0xc6   :  { %2018 = vmatpush1.bf16.msra.mxu0 %v2017_v23  ;;  %325 = vperm.xlu1 %2216, %v141_v58   ;;  %v303_v7 = vmul.f32 %v2895_v20, %v2824_v26  ;;  %v2978_v60 = vld [vmem:[#allocation2 + $0x158] sm:$0xff]  ;;  %v2063_v26 = vpack.c.bf16 %v2974_v51, %v2972_v50  ;;  %v2990_v20 = vld [vmem:[#allocation2 + $0x150] sm:$0xff]  ;;  %v2099_v19 = vpack.c.bf16 %v2998_v40, %v2996_v35  ;;  %v3026_v23 = vld [vmem:[#allocation5 + $0x140] sm:$0xff] }
  0xc7   :  { %2020 = vmatprep.subr.bf16.mxu0 %v2019_v30  ;;  %v2025_v54 = vpack.c.bf16 %v293_v0, %v285_v22  ;;  %v2059_v46 = vpack.c.bf16 %v312_v53, %v304_v48  ;;  %v2029_v18 = vpack.c.bf16 %v309_v63, %v301_v44  ;;  %v2095_v5 = vpack.c.bf16 %v2978_v60, %v2976_v15  ;;  %v3031_v30 = vld [vmem:[#allocation5 + $0x150] sm:$0xff] }
  0xc8   :  { %2050 = vmatpush1.bf16.msra.mxu1 %v2049_v33  ;;  %v2061_v49 = vpack.c.bf16 %v311_v14, %v303_v7  ;;  %v2097_v6 = vpack.c.bf16 %v2990_v20, %v2986_v62  ;;  %v3029_v33 = vld [vmem:[#allocation5 + $0x110] sm:$0xff]  ;;  %v2069_v58 = vpack.c.bf16 %v3004_v55, %v3000_v52  ;;  %v2071_v22 = vpack.c.bf16 %v3014_v12, %v3012_v16 }
  0xc9   :  { %2052 = vmatprep.subr.bf16.mxu1 %v2051_v34  ;;  %320 = vperm.xlu0 %2215, %v140_v29   ;;  %v2101_v34 = vpack.c.bf16 %v3008_v3, %v3006_v9  ;;  %v2103_v0 = vpack.c.bf16 %v3022_v61, %v3016_v11  ;;  %v2073_v1 = vpack.c.bf16 %v3026_v23, %v3024_v8  ;;  %v3059_v29 = vld [vmem:[#allocation5 + $0x180] sm:$0xff]  ;;  %v3076_v44 = vld [vmem:[#allocation5 + $0x190] sm:$0xff] }
  0xca   :  { %2022 = vmatpush1.bf16.msra.mxu0 %v2021_v37  ;;  %330 = vperm.xlu1 %2216, %v142_v45   ;;  %v3046_v37 = vld [vmem:[#allocation5 + $0x1d8] sm:$0xff]  ;;  %v2105_v43 = vpack.c.bf16 %v3031_v30, %v3029_v33  ;;  %v862_v47 = vsub.f32 %v2976_v15, %v3016_v11  ;;  %v870_v38 = vsub.f32 %v2978_v60, %v3022_v61  ;;  %v3078_v63 = vld [vmem:[#allocation5 + $0x1d0] sm:$0xff] }
  0xcb   :  { %2024 = vmatprep.subr.bf16.mxu0 %v2023_v25  ;;  %v868_v25 = vsub.f32 %v2974_v51, %v3014_v12  ;;  %v2075_v48 = vpack.c.bf16 %v3042_v42, %v3033_v31  ;;  %v2107_v53 = vpack.c.bf16 %v3046_v37, %v3044_v28  ;;  %v861_v7 = vsub.f32 %v2986_v62, %v3029_v33 }
  0xcc   :  { %2054 = vmatpush1.bf16.msra.mxu1 %v2053_v57  ;;  %v3061_v57 = vld [vmem:[#allocation5 + $0x1c0] sm:$0xff]  ;;  %v869_v14 = vsub.f32 %v2990_v20, %v3031_v30 }
  0xcd   :  { %2056 = vmatprep.subr.bf16.mxu1 %v2055_v39  ;;  %3974 = vst [vmem:[#allocation25_spill] sm:$0xff] %v3061_v57  ;;  %v3975_v39 = vld [vmem:[#allocation24_spill] sm:$0xff]  ;;  %v900_v45 = vand.u32 2147483647, %v868_v25 }
  0xce   :  { %2026 = vmatpush1.bf16.msra.mxu0 %v2025_v54  ;;  %v892_v54 = vand.u32 2147483647, %v860_v36  ;;  %v875_v36 = vsub.f32 %v3000_v52, %v3059_v29 }
  0xcf   :  { %2028 = vmatprep.subr.bf16.mxu0 %v2027_v4  ;;  %v867_v4 = vsub.f32 %v2984_v2, %v3026_v23 }
  0xd0   :  { %2058 = vmatpush1.bf16.msra.mxu1 %v2057_v41  ;;  %v859_v41 = vsub.f32 %v2982_v27, %v3024_v8 }
  0xd1   :  { %2060 = vmatprep.subr.bf16.mxu1 %v2059_v46  ;;  %v2077_v46 = vpack.c.bf16 %v3061_v57, %v3059_v29  ;;  %v899_v25 = vand.u32 2147483647, %v867_v4 }
  0xd2   :  { %2030 = vmatpush1.bf16.msra.mxu0 %v2029_v18  ;;  %v876_v18 = vsub.f32 %v2992_v13, %v3033_v31 }
  0xd3   :  { %2064 = vmatprep.subr.bf16.mxu0 %v2063_v26  ;;  %v894_v26 = vand.u32 2147483647, %v862_v47 }
  0xd4   :  { %2062 = vmatpush1.bf16.msra.mxu1 %v2061_v49  ;;  %v884_v49 = vsub.f32 %v2994_v32, %v3042_v42  ;;  %v908_v47 = vand.u32 2147483647, %v876_v18 }
  0xd5   :  { %2096 = vmatprep.subr.bf16.mxu1 %v2095_v5  ;;  %576 = vmatmul.mubr.f32.vlgmr.msra.gmra.mrb[8].mxu0 %v3973_v17  ;;  %v902_v5 = vand.u32 2147483647, %v870_v38 }
  0xd6   :  { %2066 = vmatpush1.bf16.msra.mxu0 %v2065_v56  ;;  %581 = vmatprep.mubr.f32.mxu0 %v3972_v10  ;;  %v878_v56 = vsub.f32 %v2996_v35, %v3044_v28  ;;  %v916_v38 = vand.u32 2147483647, %v884_v49 }
  0xd7   :  { %665 = vmatmul.mubr.f32.vlgmr.msra.gmra.mrb[8].mxu1 %v3973_v17  ;;  %2068 = vmatprep.subr.bf16.mxu0 %v2067_v21  ;;  %v2109_v21 = vpack.c.bf16 %v3078_v63, %v3076_v44 }
  0xd8   :  { %2098 = vmatpush1.bf16.msra.mxu1 %v2097_v6  ;;  %670 = vmatprep.mubr.f32.mxu1 %v3972_v10  ;;  %v886_v6 = vsub.f32 %v2998_v40, %v3046_v37  ;;  %v910_v17 = vand.u32 2147483647, %v878_v56  ;;  %v3172_v56 = vld [vmem:[#allocation2 + $0x1b8] sm:$0xff] }
  0xd9   :  { %2100 = vmatprep.subr.bf16.mxu1 %v2099_v19  ;;  %582 = vmatmul.mubr.f32.gmra.mrb[10].mxu0 %v3975_v39  ;;  %v891_v19 = vand.u32 2147483647, %v859_v41  ;;  %v877_v41 = vsub.f32 %v3006_v9, %v3076_v44 }
  0xda   :  { %2070 = vmatpush1.bf16.msra.mxu0 %v2069_v58  ;;  %587 = vmatprep.mubr.f32.mxu0 %v3972_v10  ;;  %v883_v58 = vsub.f32 %v3004_v55, %v3061_v57  ;;  %v918_v57 = vand.u32 2147483647, %v886_v6  ;;  %v3174_v6 = vld [vmem:[#allocation2 + $0x1f8] sm:$0xff] }
  0xdb   :  { %2072 = vmatprep.subr.bf16.mxu0 %v2071_v22  ;;  %671 = vmatmul.mubr.f32.gmra.mrb[10].mxu1 %v3975_v39  ;;  %v893_v22 = vand.u32 2147483647, %v861_v7  ;;  %v885_v39 = vsub.f32 %v3008_v3, %v3078_v63  ;;  %v2081_v4 = vpack.c.bf16 %v899_v25, %v891_v19  ;;  %v2083_v7 = vpack.c.bf16 %v916_v38, %v908_v47  ;;  %v3178_v19 = vld [vmem:[#allocation2 + $0x1e0] sm:$0xff]  ;;  %v3186_v25 = vld [vmem:[#allocation5 + $0x128] sm:$0xff]  ;;  %v3194_v38 = vld [vmem:[#allocation5 + $0x138] sm:$0xff] }
  0xdc   :  { %2102 = vmatpush1.bf16.msra.mxu1 %v2101_v34  ;;  %676 = vmatprep.mubr.f32.mxu1 %v3972_v10  ;;  %v2079_v34 = vpack.c.bf16 %v900_v45, %v892_v54  ;;  %v924_v54 = vmul.f32 %v3012_v16, %v2972_v50  ;;  %v932_v45 = vmul.f32 %v3014_v12, %v2974_v51 }
  0xdd   :  { %2104 = vmatprep.subr.bf16.mxu1 %v2103_v0  ;;  %588 = vmatmul.mubr.f32.gmra.mrb[12].mxu0 %v2906_v24  ;;  %v901_v0 = vand.u32 2147483647, %v869_v14  ;;  %v909_v14 = vand.u32 2147483647, %v877_v41  ;;  %v917_v18 = vand.u32 2147483647, %v885_v39  ;;  %v2115_v49 = vpack.c.bf16 %v918_v57, %v910_v17 }
  0xde   :  { %2074 = vmatpush1.bf16.msra.mxu0 %v2073_v1  ;;  %593 = vmatprep.mubr.f32.mxu0 %v3972_v10  ;;  %v2111_v1 = vpack.c.bf16 %v902_v5, %v894_v26  ;;  %v926_v50 = vmul.f32 %v3016_v11, %v2976_v15  ;;  %v934_v51 = vmul.f32 %v3022_v61, %v2978_v60  ;;  %v3162_v57 = vld [vmem:[#allocation2 + $0x130] sm:$0xff]  ;;  %v3170_v5 = vld [vmem:[#allocation2 + $0x1e8] sm:$0xff]  ;;  %v3196_v41 = vld [vmem:[#allocation5 + $0x178] sm:$0xff] }
  0xdf   :  { %2076 = vmatprep.subr.bf16.mxu0 %v2075_v48  ;;  %677 = vmatmul.mubr.f32.gmra.mrb[12].mxu1 %v2906_v24  ;;  %v915_v48 = vand.u32 2147483647, %v883_v58  ;;  %v2087_v12 = vpack.c.bf16 %v932_v45, %v924_v54  ;;  %v931_v39 = vmul.f32 %v3026_v23, %v2984_v2  ;;  %v925_v17 = vmul.f32 %v3029_v33, %v2986_v62  ;;  %v3976_v33 = vld [vmem:[#allocation25_spill] sm:$0xff] }
  0xe0   :  { %2106 = vmatpush1.bf16.msra.mxu1 %v2105_v43  ;;  %682 = vmatprep.mubr.f32.mxu1 %v3972_v10  ;;  %v907_v43 = vand.u32 2147483647, %v875_v36  ;;  %v933_v15 = vmul.f32 %v3031_v30, %v2990_v20  ;;  %v2117_v60 = vpack.c.bf16 %v917_v18, %v909_v14  ;;  %v940_v11 = vmul.f32 %v3033_v31, %v2992_v13  ;;  %v3148_v31 = vld [vmem:[#allocation2 + $0x128] sm:$0xff]  ;;  %v3180_v36 = vld [vmem:[#allocation2 + $0x1b0] sm:$0xff] }
  0xe1   :  { %2108 = vmatprep.subr.bf16.mxu1 %v2107_v53  ;;  %594 = vmatmul.mubr.f32.gmra.mrb[14].mxu0 %v2927_v59  ;;  %v2113_v53 = vpack.c.bf16 %v901_v0, %v893_v22  ;;  %v948_v61 = vmul.f32 %v3042_v42, %v2994_v32  ;;  %v942_v2 = vmul.f32 %v3044_v28, %v2996_v35  ;;  %v3150_v42 = vld [vmem:[#allocation2 + $0x168] sm:$0xff]  ;;  %v3152_v28 = vld [vmem:[#allocation2 + $0x138] sm:$0xff]  ;;  %v3204_v54 = vld [vmem:[#allocation5 + $0x130] sm:$0xff] }
  0xe2   :  { %2078 = vmatpush1.bf16.msra.mxu0 %v2077_v46  ;;  %1019 = vmatprep.mubr.f32.mxu0 %v3972_v10  ;;  %v2085_v16 = vpack.c.bf16 %v915_v48, %v907_v43  ;;  %v923_v46 = vmul.f32 %v3024_v8, %v2982_v27  ;;  %v2119_v27 = vpack.c.bf16 %v934_v51, %v926_v50  ;;  %v3188_v22 = vld [vmem:[#allocation5 + $0x168] sm:$0xff]  ;;  %v3202_v48 = vld [vmem:[#allocation5 + $0x160] sm:$0xff]  ;;  %v3206_v45 = vld [vmem:[#allocation5 + $0x170] sm:$0xff] }
  0xe3   :  { %2080 = vmatprep.subr.bf16.mxu0 %v2079_v34  ;;  %683 = vmatmul.mubr.f32.gmra.mrb[14].mxu1 %v2927_v59  ;;  %v950_v62 = vmul.f32 %v3046_v37, %v2998_v40  ;;  %v2121_v20 = vpack.c.bf16 %v933_v15, %v925_v17  ;;  %v939_v23 = vmul.f32 %v3059_v29, %v3000_v52  ;;  %v3154_v52 = vld [vmem:[#allocation2 + $0x178] sm:$0xff]  ;;  %v3156_v37 = vld [vmem:[#allocation2 + $0x120] sm:$0xff]  ;;  %v3184_v34 = vld [vmem:[#allocation2 + $0x1f0] sm:$0xff] }
  0xe4   :  { %2110 = vmatpush1.bf16.msra.mxu1 %v2109_v21  ;;  %1108 = vmatprep.mubr.f32.mxu1 %v3972_v10  ;;  %v2089_v8 = vpack.c.bf16 %v931_v39, %v923_v46  ;;  %v947_v13 = vmul.f32 %v3976_v33, %v3004_v55  ;;  %v2091_v32 = vpack.c.bf16 %v948_v61, %v940_v11  ;;  %v3158_v29 = vld [vmem:[#allocation2 + $0x160] sm:$0xff]  ;;  %v3213_v14 = vld [vmem:[#allocation5 + $0x1a8] sm:$0xff]  ;;  %v3220_v50 = vld [vmem:[#allocation5 + $0x1b8] sm:$0xff] }
  0xe5   :  { %2112 = vmatprep.subr.bf16.mxu1 %v2111_v1  ;;  %v941_v30 = vmul.f32 %v3076_v44, %v3006_v9  ;;  %v949_v35 = vmul.f32 %v3078_v63, %v3008_v3  ;;  %v2123_v40 = vpack.c.bf16 %v950_v62, %v942_v2  ;;  %v2127_v3 = vpack.c.bf16 %v3150_v42, %v3148_v31  ;;  %v3164_v44 = vld [vmem:[#allocation2 + $0x170] sm:$0xff]  ;;  %v3166_v63 = vld [vmem:[#allocation2 + $0x1a8] sm:$0xff]  ;;  %v3176_v21 = vld [vmem:[#allocation2 + $0x1a0] sm:$0xff] }
  0xe6   :  { %2082 = vmatpush1.bf16.msra.mxu0 %v2081_v4  ;;  %v2093_v55 = vpack.c.bf16 %v947_v13, %v939_v23  ;;  %v2159_v26 = vpack.c.bf16 %v3154_v52, %v3152_v28  ;;  %v2129_v58 = vpack.c.bf16 %v3158_v29, %v3156_v37  ;;  %v2161_v0 = vpack.c.bf16 %v3164_v44, %v3162_v57  ;;  %v3198_v1 = vld [vmem:[#allocation5 + $0x120] sm:$0xff]  ;;  %v3215_v18 = vld [vmem:[#allocation5 + $0x1e8] sm:$0xff]  ;;  %v3222_v51 = vld [vmem:[#allocation5 + $0x1f8] sm:$0xff] }
  0xe7   :  { %2084 = vmatprep.subr.bf16.mxu0 %v2083_v7  ;;  %v2125_v9 = vpack.c.bf16 %v949_v35, %v941_v30  ;;  %v2131_v47 = vpack.c.bf16 %v3170_v5, %v3166_v63  ;;  %v2163_v43 = vpack.c.bf16 %v3174_v6, %v3172_v56  ;;  %v3977_v4 = vld [vmem:[#allocation23_spill] sm:$0xff]  ;;  %v2165_v7 = vpack.c.bf16 %v3184_v34, %v3180_v36  ;;  %v3979_v2 = vld [vmem:[#allocation24_spill] sm:$0xff] }
  0xe8   :  { %2114 = vmatpush1.bf16.msra.mxu1 %v2113_v53  ;;  %v2133_v53 = vpack.c.bf16 %v3178_v19, %v3176_v21  ;;  %v2167_v46 = vpack.c.bf16 %v3196_v41, %v3194_v38  ;;  %v2137_v39 = vpack.c.bf16 %v3202_v48, %v3198_v1  ;;  %v2169_v17 = vpack.c.bf16 %v3206_v45, %v3204_v54  ;;  %v3239_v11 = vld [vmem:[#allocation5 + $0x1e0] sm:$0xff]  ;;  %v3254_v23 = vld [vmem:[#allocation5 + $0x1b0] sm:$0xff] }
  0xe9   :  { %2116 = vmatprep.subr.bf16.mxu1 %v2115_v49  ;;  %v2135_v49 = vpack.c.bf16 %v3188_v22, %v3186_v25  ;;  %v2139_v15 = vpack.c.bf16 %v3215_v18, %v3213_v14  ;;  %3978 = vst [vmem:[#allocation25_spill] sm:$0xff] %v3239_v11  ;;  %v866_v61 = vsub.f32 %v3152_v28, %v3194_v38  ;;  %v3256_v33 = vld [vmem:[#allocation5 + $0x1f0] sm:$0xff] }
  0xea   :  { %2086 = vmatpush1.bf16.msra.mxu0 %v2085_v16  ;;  %v864_v16 = vsub.f32 %v3148_v31, %v3186_v25  ;;  %v2171_v62 = vpack.c.bf16 %v3222_v51, %v3220_v50  ;;  %v865_v30 = vsub.f32 %v3162_v57, %v3204_v54  ;;  %v873_v35 = vsub.f32 %v3164_v44, %v3206_v45 }
  0xeb   :  { %2088 = vmatprep.subr.bf16.mxu0 %v2087_v12  ;;  %v872_v12 = vsub.f32 %v3150_v42, %v3188_v22 }
  0xec   :  { %2118 = vmatpush1.bf16.msra.mxu1 %v2117_v60  ;;  %v3237_v60 = vld [vmem:[#allocation5 + $0x1a0] sm:$0xff]  ;;  %v896_v13 = vand.u32 2147483647, %v864_v16 }
  0xed   :  { %2120 = vmatprep.subr.bf16.mxu1 %v2119_v27  ;;  %v874_v27 = vsub.f32 %v3154_v52, %v3196_v41 }
  0xee   :  { %2090 = vmatpush1.bf16.msra.mxu0 %v2089_v8  ;;  %v863_v8 = vsub.f32 %v3156_v37, %v3198_v1 }
  0xef   :  { %2092 = vmatprep.subr.bf16.mxu0 %v2091_v32  ;;  %v904_v32 = vand.u32 2147483647, %v872_v12  ;;  %v897_v12 = vand.u32 2147483647, %v865_v30 }
  0xf0   :  { %2122 = vmatpush1.bf16.msra.mxu1 %v2121_v20  ;;  %v871_v20 = vsub.f32 %v3158_v29, %v3202_v48 }
  0xf1   :  { %2124 = vmatprep.subr.bf16.mxu1 %v2123_v40  ;;  %v2141_v40 = vpack.c.bf16 %v3239_v11, %v3237_v60 }
  0xf2   :  { %2094 = vmatpush1.bf16.msra.mxu0 %v2093_v55  ;;  %v880_v55 = vsub.f32 %v3166_v63, %v3213_v14  ;;  %v903_v16 = vand.u32 2147483647, %v871_v20  ;;  %v928_v20 = vmul.f32 %v3186_v25, %v3148_v31  ;;  %v930_v31 = vmul.f32 %v3194_v38, %v3152_v28 }
  0xf3   :  { %2128 = vmatprep.subr.bf16.mxu0 %v2127_v3  ;;  %v898_v3 = vand.u32 2147483647, %v866_v61  ;;  %v937_v28 = vmul.f32 %v3206_v45, %v3164_v44  ;;  %v944_v38 = vmul.f32 %v3213_v14, %v3166_v63  ;;  %v945_v45 = vmul.f32 %v3254_v23, %v3180_v36 }
  0xf4   :  { %2126 = vmatpush1.bf16.msra.mxu1 %v2125_v9  ;;  %v888_v9 = vsub.f32 %v3170_v5, %v3215_v18  ;;  %v912_v61 = vand.u32 2147483647, %v880_v55 }
  0xf5   :  { %2160 = vmatprep.subr.bf16.mxu1 %v2159_v26  ;;  %1020 = vmatmul.mubr.f32.vlgmr.msra.gmra.mrb[16].mxu0 %v3977_v4  ;;  %v906_v26 = vand.u32 2147483647, %v874_v27 }
  0xf6   :  { %2130 = vmatpush1.bf16.msra.mxu0 %v2129_v58  ;;  %1025 = vmatprep.mubr.f32.mxu0 %v3972_v10  ;;  %v882_v58 = vsub.f32 %v3172_v56, %v3220_v50  ;;  %v920_v27 = vand.u32 2147483647, %v888_v9 }
  0xf7   :  { %1109 = vmatmul.mubr.f32.vlgmr.msra.gmra.mrb[16].mxu1 %v3977_v4  ;;  %2132 = vmatprep.subr.bf16.mxu0 %v2131_v47  ;;  %v2173_v47 = vpack.c.bf16 %v3256_v33, %v3254_v23 }
  0xf8   :  { %2162 = vmatpush1.bf16.msra.mxu1 %v2161_v0  ;;  %1114 = vmatprep.mubr.f32.mxu1 %v3972_v10  ;;  %v890_v0 = vsub.f32 %v3174_v6, %v3222_v51  ;;  %v914_v4 = vand.u32 2147483647, %v882_v58  ;;  %v2147_v30 = vpack.c.bf16 %v920_v27, %v912_v61 }
  0xf9   :  { %2164 = vmatprep.subr.bf16.mxu1 %v2163_v43  ;;  %1026 = vmatmul.mubr.f32.gmra.mrb[18].mxu0 %v3979_v2  ;;  %v895_v43 = vand.u32 2147483647, %v863_v8  ;;  %v881_v8 = vsub.f32 %v3180_v36, %v3254_v23 }
  0xfa   :  { %2134 = vmatpush1.bf16.msra.mxu0 %v2133_v53  ;;  %1031 = vmatprep.mubr.f32.mxu0 %v3972_v10  ;;  %v879_v53 = vsub.f32 %v3176_v21, %v3237_v60 }
  0xfb   :  { %2136 = vmatprep.subr.bf16.mxu0 %v2135_v49  ;;  %1115 = vmatmul.mubr.f32.gmra.mrb[18].mxu1 %v3979_v2  ;;  %v2143_v49 = vpack.c.bf16 %v904_v32, %v896_v13  ;;  %v889_v2 = vsub.f32 %v3184_v34, %v3256_v33  ;;  %v936_v13 = vmul.f32 %v3188_v22, %v3150_v42 }
  0xfc   :  { %2166 = vmatpush1.bf16.msra.mxu1 %v2165_v7  ;;  %1120 = vmatprep.mubr.f32.mxu1 %v3972_v10  ;;  %v887_v7 = vsub.f32 %v3178_v19, %v3239_v11  ;;  %v922_v11 = vand.u32 2147483647, %v890_v0  ;;  %v2145_v32 = vpack.c.bf16 %v903_v16, %v895_v43  ;;  %v938_v42 = vmul.f32 %v3196_v41, %v3154_v52 }
  0xfd   :  { %2168 = vmatprep.subr.bf16.mxu1 %v2167_v46  ;;  %1032 = vmatmul.mubr.f32.gmra.mrb[20].mxu0 %v2906_v24  ;;  %v905_v46 = vand.u32 2147483647, %v873_v35  ;;  %v913_v35 = vand.u32 2147483647, %v881_v8  ;;  %v921_v55 = vand.u32 2147483647, %v889_v2  ;;  %v2151_v22 = vpack.c.bf16 %v936_v13, %v928_v20 }
  0xfe   :  { %2138 = vmatpush1.bf16.msra.mxu0 %v2137_v39  ;;  %1037 = vmatprep.mubr.f32.mxu0 %v3972_v10  ;;  %v2175_v39 = vpack.c.bf16 %v906_v26, %v898_v3  ;;  %v2179_v9 = vpack.c.bf16 %v922_v11, %v914_v4  ;;  %v935_v2 = vmul.f32 %v3202_v48, %v3158_v29 }
  0xff   :  { %2140 = vmatprep.subr.bf16.mxu0 %v2139_v15  ;;  %1121 = vmatmul.mubr.f32.gmra.mrb[20].mxu1 %v2906_v24  ;;  %v919_v15 = vand.u32 2147483647, %v887_v7  ;;  %v929_v4 = vmul.f32 %v3204_v54, %v3162_v57  ;;  %v2181_v52 = vpack.c.bf16 %v921_v55, %v913_v35  ;;  %v952_v41 = vmul.f32 %v3215_v18, %v3170_v5  ;;  %v3980_v54 = vld [vmem:[#allocation25_spill] sm:$0xff] }
 0x100   :  { %2170 = vmatpush1.bf16.msra.mxu1 %v2169_v17  ;;  %1126 = vmatprep.mubr.f32.mxu1 %v3972_v10  ;;  %v911_v17 = vand.u32 2147483647, %v879_v53  ;;  %v946_v29 = vmul.f32 %v3220_v50, %v3172_v56  ;;  %v954_v57 = vmul.f32 %v3222_v51, %v3174_v6  ;;  %v943_v48 = vmul.f32 %v3237_v60, %v3176_v21  ;;  %v3981_v21 = vld [vmem:[#allocation23_spill] sm:$0xff] }
 0x101   :  { %2172 = vmatprep.subr.bf16.mxu1 %v2171_v62  ;;  %1038 = vmatmul.mubr.f32.gmra.mrb[22].mxu0 %v2927_v59  ;;  %v2177_v62 = vpack.c.bf16 %v905_v46, %v897_v12  ;;  %v2185_v44 = vpack.c.bf16 %v937_v28, %v929_v4  ;;  %v951_v63 = vmul.f32 %v3980_v54, %v3178_v19  ;;  %v3982_v19 = vld [vmem:[#allocation24_spill] sm:$0xff] }
 0x102   :  { %2142 = vmatpush1.bf16.msra.mxu0 %v2141_v40  ;;  %1197 = vmatprep.mubr.f32.mxu0 %v3972_v10  ;;  %v2149_v25 = vpack.c.bf16 %v919_v15, %v911_v17  ;;  %v927_v40 = vmul.f32 %v3198_v1, %v3156_v37  ;;  %v2183_v37 = vpack.c.bf16 %v938_v42, %v930_v31 }
 0x103   :  { %2144 = vmatprep.subr.bf16.mxu0 %v2143_v49  ;;  %1127 = vmatmul.mubr.f32.gmra.mrb[22].mxu1 %v2927_v59  ;;  %v2155_v5 = vpack.c.bf16 %v952_v41, %v944_v38  ;;  %v953_v56 = vmul.f32 %v3256_v33, %v3184_v34  ;;  %v2187_v6 = vpack.c.bf16 %v954_v57, %v946_v29 }
 0x104   :  { %2174 = vmatpush1.bf16.msra.mxu1 %v2173_v47  ;;  %1286 = vmatprep.mubr.f32.mxu1 %v3972_v10  ;;  %v2153_v1 = vpack.c.bf16 %v935_v2, %v927_v40  ;;  %v2157_v14 = vpack.c.bf16 %v951_v63, %v943_v48 }
 0x105   :  { %2176 = vmatprep.subr.bf16.mxu1 %v2175_v39  ;;  %v2189_v18 = vpack.c.bf16 %v953_v56, %v945_v45 }
 0x106   :  { %2146 = vmatpush1.bf16.msra.mxu0 %v2145_v32 }
 0x107   :  { %2148 = vmatprep.subr.bf16.mxu0 %v2147_v30 }
 0x108   :  { %2178 = vmatpush1.bf16.msra.mxu1 %v2177_v62 }
 0x109   :  { %2180 = vmatprep.subr.bf16.mxu1 %v2179_v9 }
 0x10a   :  { %2150 = vmatpush1.bf16.msra.mxu0 %v2149_v25 }
 0x10b   :  { %2152 = vmatprep.subr.bf16.mxu0 %v2151_v22 }
 0x10c   :  { %2182 = vmatpush1.bf16.msra.mxu1 %v2181_v52 }
 0x10d   :  { %2184 = vmatprep.subr.bf16.mxu1 %v2183_v37 }
 0x10e   :  { %2154 = vmatpush1.bf16.msra.mxu0 %v2153_v1 }
 0x10f   :  { %2156 = vmatprep.subr.bf16.mxu0 %v2155_v5 }
 0x110   :  { %2186 = vmatpush1.bf16.msra.mxu1 %v2185_v44 }
 0x111   :  { %2188 = vmatprep.subr.bf16.mxu1 %v2187_v6 }
 0x112   :  { %2158 = vmatpush1.bf16.msra.mxu0 %v2157_v14 }
 0x114   :  { %2190 = vmatpush1.bf16.msra.mxu1 %v2189_v18 }
 0x115   :  { %1198 = vmatmul.mubr.f32.vlgmr.msra.gmra.mrb[24].mxu0 %v3981_v21 }
 0x116   :  { %1203 = vmatprep.mubr.f32.mxu0 %v3972_v10 }
 0x117   :  { %1287 = vmatmul.mubr.f32.vlgmr.msra.gmra.mrb[24].mxu1 %v3981_v21 }
 0x118   :  { %1292 = vmatprep.mubr.f32.mxu1 %v3972_v10 }
 0x119   :  { %1204 = vmatmul.mubr.f32.gmra.mrb[26].mxu0 %v3982_v19 }
 0x11a   :  { %1209 = vmatprep.mubr.f32.mxu0 %v3972_v10 }
 0x11b   :  { %1293 = vmatmul.mubr.f32.gmra.mrb[26].mxu1 %v3982_v19 }
 0x11c   :  { %1298 = vmatprep.mubr.f32.mxu1 %v3972_v10 }
 0x11d   :  { %1210 = vmatmul.mubr.f32.gmra.mrb[28].mxu0 %v2906_v24 }
 0x11e   :  { %1215 = vmatprep.mubr.f32.mxu0 %v3972_v10 }
 0x11f   :  { %1299 = vmatmul.mubr.f32.gmra.mrb[28].mxu1 %v2906_v24 }
 0x120   :  { %1304 = vmatprep.mubr.f32.mxu1 %v3972_v10 }
 0x121   :  { %1216 = vmatmul.mubr.f32.gmra.mrb[30].mxu0 %v2927_v59 }
 0x122   :  { %1924 = vmatprep.mubr.msk.f32.mxu0 %vm2462_vm0, %v3972_v10 }
 0x123   :  { %1305 = vmatmul.mubr.f32.gmra.mrb[30].mxu1 %v2927_v59 }
 0x144   :  { %v3338_v7 = vpop.permute.xlu0 %315 }
 0x145   :  { %v3348_v12 = vpop.permute.xlu1 %325 }
 0x148   :  { %v3346_v16 = vpop.permute.xlu0 %320 }
 0x149   :  { %v3380_v55 = vpop.permute.xlu1 %330 }
 0x188   :  { %v399_v36 = vpop.f32.mrb[0].mxu0 }
 0x189   :  { %v401_v34 = vpop.f32.mrb[1].mxu0  ;;  %v3341_v59 = vadd.f32 %v399_v36, %v3338_v7 }
 0x18a   :  { %v488_v50 = vpop.f32.mrb[0].mxu1  ;;  %v3344_v49 = vadd.f32 %v401_v34, %v3338_v7 }
 0x18b   :  { %v490_v51 = vpop.f32.mrb[1].mxu1  ;;  %v3351_v46 = vadd.f32 %v488_v50, %v3338_v7  ;;  %v3921_v61 = vmax.f32 %v3341_v59, 0.0 }
 0x18c   :  { %v405_v60 = vpop.f32.mrb[2].mxu0  ;;  %v3920_v27 = vmax.f32 %v3344_v49, 0.0  ;;  %v3369_v13 = vadd.f32 %v490_v51, %v3338_v7 }
 0x18d   :  { %v407_v11 = vpop.f32.mrb[3].mxu0  ;;  %v3356_v8 = vadd.f32 %v405_v60, %v3346_v16  ;;  %v3919_v20 = vmax.f32 %v3351_v46, 0.0 }
 0x18e   :  { %v494_v23 = vpop.f32.mrb[2].mxu1  ;;  %v3359_v39 = vadd.f32 %v407_v11, %v3346_v16  ;;  %v721_v32 = vadd.f32 %v3920_v27, %v3921_v61  ;;  %v3917_v4 = vmax.f32 %v3369_v13, 0.0 }
 0x18f   :  { %v496_v33 = vpop.f32.mrb[3].mxu1  ;;  %v3932_v62 = vmax.f32 %v3356_v8, 0.0  ;;  %v3378_v35 = vadd.f32 %v494_v23, %v3346_v16 }
 0x190   :  { %v411_v3 = vpop.f32.mrb[4].mxu0  ;;  %v3931_v30 = vmax.f32 %v3359_v39, 0.0  ;;  %v3383_v9 = vadd.f32 %v496_v33, %v3346_v16  ;;  %v722_v2 = vadd.f32 %v721_v32, %v3919_v20 }
 0x191   :  { %v413_v26 = vpop.f32.mrb[5].mxu0  ;;  %v3362_v17 = vadd.f32 %v411_v3, %v3348_v12  ;;  %v3930_v52 = vmax.f32 %v3378_v35, 0.0 }
 0x192   :  { %v500_v58 = vpop.f32.mrb[4].mxu1  ;;  %v3365_v15 = vadd.f32 %v413_v26, %v3348_v12  ;;  %v730_v28 = vadd.f32 %v3931_v30, %v3932_v62  ;;  %v3929_v38 = vmax.f32 %v3383_v9, 0.0  ;;  %v723_v14 = vadd.f32 %v722_v2, %v3917_v4 }
 0x193   :  { %v502_v24 = vpop.f32.mrb[5].mxu1  ;;  %3983 = vst [vmem:[#allocation25_spill] sm:$0xff] %v3362_v17  ;;  %v3904_v31 = vmax.f32 %v3362_v17, 0.0  ;;  %v3388_v25 = vadd.f32 %v500_v58, %v3348_v12 }
 0x194   :  { %v417_v0 = vpop.f32.mrb[6].mxu0  ;;  %3984 = vst [vmem:[#allocation23_spill] sm:$0xff] %v3365_v15  ;;  %v3902_v42 = vmax.f32 %v3365_v15, 0.0  ;;  %v3406_v41 = vadd.f32 %v502_v24, %v3348_v12  ;;  %v731_v18 = vadd.f32 %v730_v28, %v3930_v52 }
 0x195   :  { %v419_v47 = vpop.f32.mrb[7].mxu0  ;;  %3985 = vst [vmem:[#allocation24_spill] sm:$0xff] %v3388_v25  ;;  %v3391_v22 = vadd.f32 %v417_v0, %v3380_v55  ;;  %v3901_v57 = vmax.f32 %v3388_v25, 0.0 }
 0x196   :  { %v506_v43 = vpop.f32.mrb[6].mxu1  ;;  %v3394_v40 = vadd.f32 %v419_v47, %v3380_v55  ;;  %3986 = vst [vmem:[#allocation26_spill] sm:$0xff] %v3406_v41  ;;  %v739_v29 = vadd.f32 %v3902_v42, %v3904_v31  ;;  %v3903_v51 = vmax.f32 %v3406_v41, 0.0  ;;  %v732_v0 = vadd.f32 %v731_v18, %v3929_v38 }
 0x197   :  { %v508_v53 = vpop.f32.mrb[7].mxu1  ;;  %v3414_v1 = vadd.f32 %v506_v43, %v3380_v55  ;;  %v3907_v63 = vmax.f32 %v3391_v22, 0.0 }
 0x198   :  { %v3906_v5 = vmax.f32 %v3394_v40, 0.0  ;;  %v3436_v36 = vadd.f32 %v508_v53, %v3380_v55  ;;  %v740_v3 = vadd.f32 %v739_v29, %v3901_v57 }
 0x199   :  { %v3905_v58 = vmax.f32 %v3414_v1, 0.0 }
 0x19a   :  { %v748_v26 = vadd.f32 %v3906_v5, %v3907_v63  ;;  %v3910_v2 = vmax.f32 %v3436_v36, 0.0 }
 0x1a8   :  { %v577_v37 = vpop.f32.mrb[8].mxu0 }
 0x1a9   :  { %v3417_v44 = vadd.f32 %v577_v37, %v3338_v7  ;;  %v579_v48 = vpop.f32.mrb[9].mxu0 }
 0x1aa   :  { %v666_v54 = vpop.f32.mrb[8].mxu1  ;;  %v3422_v45 = vadd.f32 %v579_v48, %v3338_v7 }
 0x1ab   :  { %v3425_v56 = vadd.f32 %v666_v54, %v3338_v7  ;;  %v668_v6 = vpop.f32.mrb[9].mxu1  ;;  %v3916_v21 = vmax.f32 %v3417_v44, 0.0 }
 0x1ac   :  { %v3433_v19 = vadd.f32 %v668_v6, %v3338_v7  ;;  %v3913_v34 = vmax.f32 %v3422_v45, 0.0  ;;  %v583_v50 = vpop.f32.mrb[10].mxu0 }
 0x1ad   :  { %v724_v60 = vadd.f32 %v723_v14, %v3916_v21  ;;  %v3443_v11 = vadd.f32 %v583_v50, %v3346_v16  ;;  %v3912_v23 = vmax.f32 %v3425_v56, 0.0  ;;  %v585_v33 = vpop.f32.mrb[11].mxu0 }
 0x1ae   :  { %v3454_v24 = vadd.f32 %v585_v33, %v3346_v16  ;;  %v3908_v53 = vmax.f32 %v3433_v19, 0.0  ;;  %v672_v32 = vpop.f32.mrb[10].mxu1  ;;  %v749_v33 = vadd.f32 %v748_v26, %v3905_v58 }
 0x1af   :  { %v725_v47 = vadd.f32 %v724_v60, %v3913_v34  ;;  %v3928_v43 = vmax.f32 %v3443_v11, 0.0  ;;  %v3465_v29 = vadd.f32 %v672_v32, %v3346_v16  ;;  %v674_v48 = vpop.f32.mrb[11].mxu1  ;;  %v741_v60 = vadd.f32 %v740_v3, %v3903_v51 }
 0x1b0   :  { %v3927_v28 = vmax.f32 %v3454_v24, 0.0  ;;  %v589_v37 = vpop.f32.mrb[12].mxu0  ;;  %v3475_v50 = vadd.f32 %v674_v48, %v3346_v16  ;;  %v750_v63 = vadd.f32 %v749_v33, %v3910_v2 }
 0x1b1   :  { %v733_v54 = vadd.f32 %v732_v0, %v3928_v43  ;;  %v726_v6 = vadd.f32 %v725_v47, %v3912_v23  ;;  %v3472_v14 = vadd.f32 %v589_v37, %v3348_v12  ;;  %v591_v18 = vpop.f32.mrb[13].mxu0  ;;  %v3926_v32 = vmax.f32 %v3465_v29, 0.0 }
 0x1b2   :  { %v3483_v0 = vadd.f32 %v591_v18, %v3348_v12  ;;  %v3923_v57 = vmax.f32 %v3475_v50, 0.0  ;;  %v678_v48 = vpop.f32.mrb[12].mxu1 }
 0x1b3   :  { %3987 = vst [vmem:[#allocation27_spill] sm:$0xff] %v3472_v14  ;;  %v734_v47 = vadd.f32 %v733_v54, %v3927_v28  ;;  %v3909_v37 = vmax.f32 %v3472_v14, 0.0  ;;  %v727_v42 = vadd.f32 %v726_v6, %v3908_v53  ;;  %v3493_v26 = vadd.f32 %v678_v48, %v3348_v12  ;;  %v680_v31 = vpop.f32.mrb[13].mxu1 }
 0x1b4   :  { %3988 = vst [vmem:[#allocation28_spill] sm:$0xff] %v3483_v0  ;;  %v3911_v3 = vmax.f32 %v3483_v0, 0.0  ;;  %v595_v51 = vpop.f32.mrb[14].mxu0  ;;  %v3503_v6 = vadd.f32 %v680_v31, %v3348_v12 }
 0x1b5   :  { %3989 = vst [vmem:[#allocation29_spill] sm:$0xff] %v3493_v26  ;;  %v742_v18 = vadd.f32 %v741_v60, %v3909_v37  ;;  %v735_v54 = vadd.f32 %v734_v47, %v3926_v32  ;;  %v3500_v58 = vadd.f32 %v595_v51, %v3380_v55  ;;  %728 = vadd.xlane.f32.xlu0 %v727_v42  ;;  %v597_v5 = vpop.f32.mrb[15].mxu0  ;;  %v3914_v48 = vmax.f32 %v3493_v26, 0.0 }
 0x1b6   :  { %3990 = vst [vmem:[#allocation30_spill] sm:$0xff] %v3503_v6  ;;  %v3509_v53 = vadd.f32 %v597_v5, %v3380_v55  ;;  %v3922_v51 = vmax.f32 %v3503_v6, 0.0  ;;  %v684_v42 = vpop.f32.mrb[14].mxu1 }
 0x1b7   :  { %v743_v60 = vadd.f32 %v742_v18, %v3911_v3  ;;  %v3915_v47 = vmax.f32 %v3500_v58, 0.0  ;;  %v736_v31 = vadd.f32 %v735_v54, %v3923_v57  ;;  %v3519_v33 = vadd.f32 %v684_v42, %v3380_v55  ;;  %v686_v2 = vpop.f32.mrb[15].mxu1 }
 0x1b8   :  { %v3918_v37 = vmax.f32 %v3509_v53, 0.0  ;;  %v3526_v3 = vadd.f32 %v686_v2, %v3380_v55 }
 0x1b9   :  { %v751_v5 = vadd.f32 %v750_v63, %v3915_v47  ;;  %v744_v18 = vadd.f32 %v743_v60, %v3914_v48  ;;  %737 = vadd.xlane.f32.xlu1 %v736_v31  ;;  %v3924_v23 = vmax.f32 %v3519_v33, 0.0 }
 0x1ba   :  { %v3925_v34 = vmax.f32 %v3526_v3, 0.0 }
 0x1bb   :  { %v752_v54 = vadd.f32 %v751_v5, %v3918_v37  ;;  %v745_v42 = vadd.f32 %v744_v18, %v3922_v51 }
 0x1bd   :  { %v753_v63 = vadd.f32 %v752_v54, %v3924_v23  ;;  %746 = vadd.xlane.f32.xlu1 %v745_v42 }
 0x1bf   :  { %v754_v60 = vadd.f32 %v753_v63, %v3925_v34 }
 0x1c1   :  { %755 = vadd.xlane.f32.xlu0 %v754_v60 }
 0x1c8   :  { %v1021_v2 = vpop.f32.mrb[16].mxu0 }
 0x1c9   :  { %v1023_v31 = vpop.f32.mrb[17].mxu0  ;;  %v3539_v23 = vadd.f32 %v1021_v2, %v3338_v7 }
 0x1ca   :  { %v1110_v48 = vpop.f32.mrb[16].mxu1  ;;  %v3542_v63 = vadd.f32 %v1023_v31, %v3338_v7 }
 0x1cb   :  { %v1112_v47 = vpop.f32.mrb[17].mxu1  ;;  %v3935_v32 = vmax.f32 %v3539_v23, 0.0  ;;  %v3553_v43 = vadd.f32 %v1110_v48, %v3338_v7 }
 0x1cc   :  { %v1027_v21 = vpop.f32.mrb[18].mxu0  ;;  %v3934_v28 = vmax.f32 %v3542_v63, 0.0 }
 0x1cd   :  { %v1029_v4 = vpop.f32.mrb[19].mxu0  ;;  %v3545_v60 = vadd.f32 %v1027_v21, %v3346_v16  ;;  %v3940_v48 = vmax.f32 %v3553_v43, 0.0 }
 0x1ce   :  { %v1116_v5 = vpop.f32.mrb[18].mxu1  ;;  %v3548_v34 = vadd.f32 %v1029_v4, %v3346_v16  ;;  %v1343_v52 = vadd.f32 %v3934_v28, %v3935_v32 }
 0x1cf   :  { %v1118_v20 = vpop.f32.mrb[19].mxu1  ;;  %v3937_v31 = vmax.f32 %v3545_v60, 0.0  ;;  %v3564_v4 = vadd.f32 %v1116_v5, %v3346_v16 }
 0x1d0   :  { %v1033_v37 = vpop.f32.mrb[20].mxu0  ;;  %v3936_v21 = vmax.f32 %v3548_v34, 0.0  ;;  %v3585_v28 = vadd.f32 %v1118_v20, %v3346_v16 }
 0x1d1   :  { %v1035_v27 = vpop.f32.mrb[21].mxu0  ;;  %v3556_v38 = vadd.f32 %v1033_v37, %v3348_v12  ;;  %v3572_v37 = vadd.f32 %v1112_v47, %v3338_v7  ;;  %v3998_v26 = vmax.f32 %v3564_v4, 0.0 }
 0x1d2   :  { %v1122_v61 = vpop.f32.mrb[20].mxu1  ;;  %v3559_v2 = vadd.f32 %v1035_v27, %v3348_v12  ;;  %v1352_v5 = vadd.f32 %v3936_v21, %v3937_v31 }
 0x1d3   :  { %v1124_v51 = vpop.f32.mrb[21].mxu1  ;;  %3991 = vst [vmem:[#allocation31_spill] sm:$0xff] %v3556_v38  ;;  %v3942_v27 = vmax.f32 %v3556_v38, 0.0  ;;  %v3577_v62 = vadd.f32 %v1122_v61, %v3348_v12  ;;  %v1344_v61 = vadd.f32 %v1343_v52, %v3940_v48 }
 0x1d4   :  { %v1039_v18 = vpop.f32.mrb[22].mxu0  ;;  %3992 = vst [vmem:[#allocation32_spill] sm:$0xff] %v3559_v2  ;;  %v3996_v21 = vmax.f32 %v3559_v2, 0.0  ;;  %v3602_v20 = vadd.f32 %v1124_v51, %v3348_v12 }
 0x1d5   :  { %v1041_v57 = vpop.f32.mrb[23].mxu0  ;;  %3993 = vst [vmem:[#allocation33_spill] sm:$0xff] %v3577_v62  ;;  %v3588_v47 = vadd.f32 %v1039_v18, %v3380_v55  ;;  %v4001_v2 = vmax.f32 %v3577_v62, 0.0 }
 0x1d6   :  { %v1128_v54 = vpop.f32.mrb[22].mxu1  ;;  %v3591_v32 = vadd.f32 %v1041_v57, %v3380_v55  ;;  %v1361_v31 = vadd.f32 %v3996_v21, %v3942_v27  ;;  %3997 = vst [vmem:[#allocation36_spill] sm:$0xff] %v3602_v20  ;;  %v1353_v57 = vadd.f32 %v1352_v5, %v3998_v26  ;;  %v4000_v26 = vmax.f32 %v3572_v37, 0.0 }
 0x1d7   :  { %v1130_v42 = vpop.f32.mrb[23].mxu1  ;;  %3994 = vst [vmem:[#allocation34_spill] sm:$0xff] %v3588_v47  ;;  %v3613_v27 = vadd.f32 %v1128_v54, %v3380_v55 }
 0x1d8   :  { %3995 = vst [vmem:[#allocation35_spill] sm:$0xff] %v3591_v32  ;;  %v1345_v5 = vadd.f32 %v1344_v61, %v4000_v26  ;;  %v1362_v38 = vadd.f32 %v1361_v31, %v4001_v2  ;;  %v4003_v2 = vmax.f32 %v3588_v47, 0.0  ;;  %v4004_v31 = vmax.f32 %v3591_v32, 0.0 }
 0x1d9   :  { %3999 = vst [vmem:[#allocation37_spill] sm:$0xff] %v3613_v27 }
 0x1da   :  { %v1370_v21 = vadd.f32 %v4004_v31, %v4003_v2  ;;  %v4007_v2 = vmax.f32 %v3602_v20, 0.0 }
 0x1dc   :  { %v1363_v31 = vadd.f32 %v1362_v38, %v4007_v2  ;;  %v4010_v38 = vmax.f32 %v3613_v27, 0.0 }
 0x1de   :  { %v1371_v2 = vadd.f32 %v1370_v21, %v4010_v38 }
 0x1e8   :  { %v1199_v18 = vpop.f32.mrb[24].mxu0 }
 0x1e9   :  { %v3608_v52 = vadd.f32 %v1199_v18, %v3338_v7  ;;  %v1201_v30 = vpop.f32.mrb[25].mxu0 }
 0x1ea   :  { %v1288_v48 = vpop.f32.mrb[24].mxu1  ;;  %v3616_v51 = vadd.f32 %v1201_v30, %v3338_v7  ;;  %v4002_v30 = vmax.f32 %v3585_v28, 0.0 }
 0x1eb   :  { %v1290_v6 = vpop.f32.mrb[25].mxu1  ;;  %v3948_v0 = vmax.f32 %v3608_v52, 0.0  ;;  %v3622_v18 = vadd.f32 %v1288_v48, %v3338_v7 }
 0x1ec   :  { %v1205_v14 = vpop.f32.mrb[26].mxu0  ;;  %v1354_v41 = vadd.f32 %v1353_v57, %v4002_v30  ;;  %v3633_v61 = vadd.f32 %v1290_v6, %v3338_v7  ;;  %v3644_v57 = vadd.f32 %v1130_v42, %v3380_v55 }
 0x1ed   :  { %v1346_v25 = vadd.f32 %v1345_v5, %v3948_v0  ;;  %v3636_v48 = vadd.f32 %v1205_v14, %v3346_v16  ;;  %v1207_v62 = vpop.f32.mrb[27].mxu0  ;;  %v4006_v14 = vmax.f32 %v3616_v51, 0.0  ;;  %v4009_v15 = vmax.f32 %v3622_v18, 0.0 }
 0x1ee   :  { %v1294_v26 = vpop.f32.mrb[26].mxu1  ;;  %4005 = vst [vmem:[#allocation38_spill] sm:$0xff] %v3644_v57  ;;  %v3647_v5 = vadd.f32 %v1207_v62, %v3346_v16 }
 0x1ef   :  { %v1296_v7 = vpop.f32.mrb[27].mxu1  ;;  %v1347_v30 = vadd.f32 %v1346_v25, %v4006_v14  ;;  %v3953_v0 = vmax.f32 %v3636_v48, 0.0  ;;  %v3654_v47 = vadd.f32 %v1294_v26, %v3346_v16 }
 0x1f0   :  { %v3955_v42 = vmax.f32 %v3647_v5, 0.0  ;;  %v3660_v54 = vadd.f32 %v1296_v7, %v3346_v16  ;;  %v1211_v62 = vpop.f32.mrb[28].mxu0 }
 0x1f1   :  { %v1355_v6 = vadd.f32 %v1354_v41, %v3953_v0  ;;  %v3666_v25 = vadd.f32 %v1211_v62, %v3348_v12  ;;  %v1213_v26 = vpop.f32.mrb[29].mxu0  ;;  %v1348_v20 = vadd.f32 %v1347_v30, %v4009_v15  ;;  %v4011_v15 = vmax.f32 %v3633_v61, 0.0 }
 0x1f2   :  { %v1300_v14 = vpop.f32.mrb[28].mxu1  ;;  %v3677_v32 = vadd.f32 %v1213_v26, %v3348_v12  ;;  %v4013_v27 = vmax.f32 %v3654_v47, 0.0 }
 0x1f3   :  { %4008 = vst [vmem:[#allocation39_spill] sm:$0xff] %v3666_v25  ;;  %v3674_v7 = vadd.f32 %v1300_v14, %v3348_v12  ;;  %v1302_v41 = vpop.f32.mrb[29].mxu1  ;;  %v1356_v0 = vadd.f32 %v1355_v6, %v3955_v42  ;;  %v3958_v17 = vmax.f32 %v3666_v25, 0.0  ;;  %v1349_v30 = vadd.f32 %v1348_v20, %v4011_v15 }
 0x1f4   :  { %v1217_v14 = vpop.f32.mrb[30].mxu0  ;;  %v3690_v16 = vadd.f32 %v1302_v41, %v3348_v12  ;;  %v4014_v15 = vmax.f32 %v3644_v57, 0.0  ;;  %v4016_v12 = vmax.f32 %v3677_v32, 0.0 }
 0x1f5   :  { %v1364_v26 = vadd.f32 %v1363_v31, %v3958_v17  ;;  %v3693_v62 = vadd.f32 %v1217_v14, %v3380_v55  ;;  %v1219_v42 = vpop.f32.mrb[31].mxu0  ;;  %1350 = vadd.xlane.f32.xlu0 %v1349_v30  ;;  %v1357_v20 = vadd.f32 %v1356_v0, %v4013_v27  ;;  %v3964_v38 = vmax.f32 %v3674_v7, 0.0 }
 0x1f6   :  { %v1306_v6 = vpop.f32.mrb[30].mxu1  ;;  %v1372_v21 = vadd.f32 %v1371_v2, %v4014_v15  ;;  %v3701_v25 = vadd.f32 %v1219_v42, %v3380_v55  ;;  %v4018_v30 = vmax.f32 %v3660_v54, 0.0  ;;  %v3963_v2 = vmax.f32 %v3690_v16, 0.0 }
 0x1f7   :  { %4012 = vst [vmem:[#allocation40_spill] sm:$0xff] %v3693_v62  ;;  %v1308_v31 = vpop.f32.mrb[31].mxu1  ;;  %v1365_v41 = vadd.f32 %v1364_v26, %v4016_v12  ;;  %v3962_v14 = vmax.f32 %v3693_v62, 0.0  ;;  %v3707_v17 = vadd.f32 %v1306_v6, %v3380_v55 }
 0x1f8   :  { %4015 = vst [vmem:[#allocation41_spill] sm:$0xff] %v3701_v25  ;;  %v1358_v0 = vadd.f32 %v1357_v20, %v4018_v30  ;;  %v3959_v27 = vmax.f32 %v3701_v25, 0.0  ;;  %v3716_v15 = vadd.f32 %v1308_v31, %v3380_v55  ;;  %v144_v31 = vld [vmem:[#allocation11] sm:$0x3] }
 0x1f9   :  { %4017 = vst [vmem:[#allocation42_spill] sm:$0xff] %v3707_v17  ;;  %v1373_v42 = vadd.f32 %v1372_v21, %v3962_v14  ;;  %v1366_v26 = vadd.f32 %v1365_v41, %v3964_v38  ;;  %v3960_v6 = vmax.f32 %v3707_v17, 0.0  ;;  %v2461_v41 = vmov 0.0|0.0  }
 0x1fa   :  { %4019 = vst [vmem:[#allocation43_spill] sm:$0xff] %v3716_v15  ;;  %1359 = vadd.xlane.f32.xlu0 %v1358_v0  ;;  %v3961_v30 = vmax.f32 %v3716_v15, 0.0  ;;  %2191 = vmatprep.subr.bf16.mxu0 %v2461_v41  ;;  %v150_v0 = vld [vmem:[#allocation14 + $0x8] sm:$0xff] }
 0x1fb   :  { %v1374_v12 = vadd.f32 %v1373_v42, %v3959_v27  ;;  %v1367_v20 = vadd.f32 %v1366_v26, %v3963_v2  ;;  %v151_v42 = vld [vmem:[#allocation14 + $0x10] sm:$0xff]  ;;  %v149_v27 = vld [vmem:[#allocation14] sm:$0xff]  ;;  %v152_v26 = vld [vmem:[#allocation14 + $0x18] sm:$0xff] }
 0x1fd   :  { %1368 = vadd.xlane.f32.xlu1 %v1367_v20  ;;  %v1375_v21 = vadd.f32 %v1374_v12, %v3960_v6 }
 0x1ff   :  { %v1376_v55 = vadd.f32 %v1375_v21, %v3961_v30 }
 0x201   :  { %1377 = vadd.xlane.f32.xlu0 %v1376_v55 }
 0x20e   :  { %1423 = vperm.xlu1 %2216, %v144_v31  }
 0x212   :  { %1508 = vperm.xlu1 %2216, %v150_v0  }
 0x216   :  { %1513 = vperm.xlu1 %2216, %v151_v42  }
 0x217   :  { %1503 = vperm.xlu0 %2215, %v149_v27  }
 0x21b   :  { %1518 = vperm.xlu0 %2215, %v152_v26  }
 0x242   :  { %v729_v12 = vpop.xlane.xlu0 %728 }
 0x243   :  { %v757_v31 = vmul.f32 0.0009765625, %v729_v12 }
 0x246   :  { %v738_v6 = vpop.xlane.xlu1 %737 }
 0x247   :  { %v758_v2 = vmul.f32 0.0009765625, %v738_v6  ;;  %v145_v6 = vld [vmem:[#allocation13] sm:$0xff] }
 0x248   :  { %1929 = vmatprep.mubr.msk.f32.mxu1 %vm1521_vm3, %v145_v6 }
 0x24a   :  { %v747_v30 = vpop.xlane.xlu1 %746 }
 0x24b   :  { %v759_v17 = vmul.f32 0.0009765625, %v747_v30 }
 0x24e   :  { %v756_v20 = vpop.xlane.xlu0 %755 }
 0x24f   :  { %v760_v25 = vmul.f32 0.0009765625, %v756_v20  ;;  %v146_v20 = vld [vmem:[#allocation13 + $0x8] sm:$0xff] }
 0x282   :  { %v1351_v21 = vpop.xlane.xlu0 %1350 }
 0x283   :  { %v1379_v55 = vmul.f32 0.0009765625, %v1351_v21 }
 0x285   :  { %v1417_v38 = vsel %vm1416_vm1, %v757_v31, %v1379_v55  ;;  %v147_v55 = vld [vmem:[#allocation13 + $0x10] sm:$0xff] }
 0x287   :  { %v1360_v14 = vpop.xlane.xlu0 %1359 }
 0x288   :  { %v1380_v0 = vmul.f32 0.0009765625, %v1360_v14  ;;  %v143_v14 = vld [vmem:[#allocation10] sm:$0x3] }
 0x28a   :  { %v1418_v15 = vsel %vm1416_vm1, %v758_v2, %v1380_v0  ;;  %v1369_v42 = vpop.xlane.xlu1 %1368 }
 0x28b   :  { %v2192_v10 = vpack.c.bf16 %v1418_v15, %v1417_v38  ;;  %v1381_v27 = vmul.f32 0.0009765625, %v1369_v42 }
 0x28d   :  { %2193 = vmatpush3.bf16.msra.mxu0 %v2192_v10  ;;  %v1419_v21 = vsel %vm1416_vm1, %v759_v17, %v1381_v27  ;;  %v148_v17 = vld [vmem:[#allocation13 + $0x18] sm:$0xff] }
 0x28e   :  { %2194 = vmatprep.subr.bf16.mxu0 %v2461_v41  ;;  %v1378_v26 = vpop.xlane.xlu0 %1377  ;;  %v1424_v38 = vpop.permute.xlu1 %1423 }
 0x28f   :  { %v1382_v62 = vmul.f32 0.0009765625, %v1378_v26 }
 0x291   :  { %v1420_v57 = vsel %vm1416_vm1, %v760_v25, %v1382_v62 }
 0x292   :  { %v2195_v12 = vpack.c.bf16 %v1420_v57, %v1419_v21  ;;  %v1509_v25 = vpop.permute.xlu1 %1508 }
 0x294   :  { %2196 = vmatpush3.bf16.msra.mxu0 %v2195_v12 }
 0x296   :  { %v1504_v57 = vpop.permute.xlu0 %1503  ;;  %v1514_v12 = vpop.permute.xlu1 %1513 }
 0x297   :  { %1925 = vmatmul.mubr.msk.f32.vlgmr.msra.gmra.mrb[32].mxu0 %vm1426_vm2, %v143_v14 }
 0x29a   :  { %v1519_v27 = vpop.permute.xlu0 %1518 }
 0x36a   :  { %v1496_v2 = vpop.f32.mrb[32].mxu0 }
 0x36b   :  { %v1497_v15 = vadd.f32 %v1496_v2, %v1424_v38  ;;  %v1926_v41 = vpop.f32.mrb[33].mxu0 }
 0x36d   :  { %v1500_v30 = vmax.f32 %v1497_v15, 0.0 }
 0x36f   :  { %1927 = vmatprep.subr.msk.mxu1 %vm1534_vm4, %v1500_v30 }
 0x370   :  { %1928 = vmatpush3.msk.msra.mxu1 %vm1534_vm4, %v1500_v30 }
 0x371   :  { %1930 = vmatmul.mubr.msk.f32.vlgmr.msra.gmra.mrb[32].mxu1 %vm1521_vm3, %v146_v20 }
 0x372   :  { %1932 = vmatprep.mubr.msk.f32.mxu1 %vm1521_vm3, %v147_v55 }
 0x375   :  { %1933 = vmatmul.mubr.msk.f32.gmra.mrb[34].mxu1 %vm1521_vm3, %v148_v17 }
 0x444   :  { %v1931_v62 = vpop.f32.mrb[32].mxu1 }
 0x445   :  { %v1610_v31 = vadd.f32 %v1931_v62, %v1509_v25  ;;  %v1604_v0 = vpop.f32.mrb[33].mxu1 }
 0x446   :  { %v1605_v10 = vadd.f32 %v1604_v0, %v1504_v57 }
 0x447   :  { %v1903_v42 = vmul.f32 -1.442695, %v1610_v31 }
 0x448   :  { %v1902_v26 = vmul.f32 -1.442695, %v1605_v10  ;;  %v1934_v21 = vpop.f32.mrb[34].mxu1 }
 0x449   :  { %2221 = vpow2.f32 %v1903_v42  ;;  %v1620_v14 = vadd.f32 %v1934_v21, %v1519_v27  ;;  %v1614_v6 = vpop.f32.mrb[35].mxu1  ;;  %v2463_v42 = vmov 1  }
 0x44a   :  { %2223 = vpow2.f32 %v1902_v26  ;;  %v1615_v38 = vadd.f32 %v1614_v6, %v1514_v12  ;;  %v4020_v26 = vmov 0   ;;  %v4021_v12 = vmax.f32 %v3356_v8, 0.0 }
 0x44b   :  { %v1905_v2 = vmul.f32 -1.442695, %v1620_v14  ;;  %v4022_v6 = vmax.f32 %v3359_v39, 0.0 }
 0x44c   :  { %v1904_v15 = vmul.f32 -1.442695, %v1615_v38 }
 0x44d   :  { %2225 = vpow2.f32 %v1905_v2  ;;  %v4023_v2 = vmax.f32 %v3378_v35, 0.0  ;;  %v4029_v35 = vmax.f32 %v3341_v59, 0.0 }
 0x44e   :  { %2227 = vpow2.f32 %v1904_v15 }
 0x453   :  { %v2222_v41 = vpop.eup %2221 }
 0x454   :  { %v2224_v30 = vpop.eup %2223  ;;  %v1636_v20 = vadd.f32 1.0, %v2222_v41  ;;  %v4024_v41 = vmax.f32 %v3383_v9, 0.0 }
 0x455   :  { %v1635_v55 = vadd.f32 1.0, %v2224_v30 }
 0x456   :  { %2229 = vrcp.f32 %v1636_v20 }
 0x457   :  { %v2226_v17 = vpop.eup %2225  ;;  %2231 = vrcp.f32 %v1635_v55  ;;  %v4025_v55 = vmax.f32 %v3443_v11, 0.0 }
 0x458   :  { %v1638_v57 = vadd.f32 1.0, %v2226_v17  ;;  %v2228_v25 = vpop.eup %2227 }
 0x459   :  { %v1637_v62 = vadd.f32 1.0, %v2228_v25 }
 0x45a   :  { %2233 = vrcp.f32 %v1638_v57  ;;  %v4026_v57 = vmax.f32 %v3454_v24, 0.0 }
 0x45b   :  { %2235 = vrcp.f32 %v1637_v62  ;;  %v4027_v62 = vmax.f32 %v3465_v29, 0.0 }
 0x460   :  { %v2230_v31 = vpop.eup %2229 }
 0x461   :  { %v2232_v0 = vpop.eup %2231  ;;  %1686 = vperm.xlu0 %2215, %v2230_v31  }
 0x462   :  { %1681 = vperm.xlu1 %2216, %v2232_v0  }
 0x464   :  { %v2234_v10 = vpop.eup %2233 }
 0x465   :  { %1696 = vperm.xlu0 %2215, %v2234_v10   ;;  %v2236_v27 = vpop.eup %2235 }
 0x466   :  { %2217 = vset.pattern.permute.xlu1 %v2463_v42 }
 0x467   :  { %1796 = vperm.xlu1 %2217, %v2232_v0   ;;  %v4030_v0 = vmax.f32 %v3344_v49, 0.0 }
 0x469   :  { %2219 = vset.pattern.permute.xlu0 %v2463_v42 }
 0x46a   :  { %1800 = vperm.xlu0 %2219, %v2230_v31   ;;  %v4028_v31 = vmax.f32 %v3475_v50, 0.0  ;;  %v4033_v50 = vmax.f32 %v3417_v44, 0.0  ;;  %v4038_v44 = vmax.f32 %v3394_v40, 0.0 }
 0x46b   :  { %2218 = vset.pattern.permute.xlu1 %v4020_v26  ;;  %v4034_v26 = vmax.f32 %v3422_v45, 0.0  ;;  %v4039_v45 = vmax.f32 %v3414_v1, 0.0 }
 0x46c   :  { %1691 = vperm.xlu1 %2218, %v2236_v27  }
 0x470   :  { %2220 = vset.pattern.permute.xlu1 %v2463_v42  ;;  %v4032_v42 = vmax.f32 %v3369_v13, 0.0  ;;  %v4037_v13 = vmax.f32 %v3391_v22, 0.0 }
 0x471   :  { %1804 = vperm.xlu1 %2220, %v2236_v27  }
 0x475   :  { %1808 = vperm.xlu1 %2220, %v2234_v10   ;;  %v4031_v10 = vmax.f32 %v3351_v46, 0.0 }
 0x4e0   :  { %v1687_v21 = vpop.permute.xlu0 %1686 }
 0x4e1   :  { %v1707_v14 = vmul.f32 %v1687_v21, %v4021_v12  ;;  %v1708_v38 = vmul.f32 %v1687_v21, %v4022_v6  ;;  %v1709_v15 = vmul.f32 %v1687_v21, %v4023_v2  ;;  %v1710_v30 = vmul.f32 %v1687_v21, %v4024_v41  ;;  %v1682_v20 = vpop.permute.xlu1 %1681 }
 0x4e2   :  { %v1711_v17 = vmul.f32 %v1687_v21, %v4025_v55  ;;  %v1712_v25 = vmul.f32 %v1687_v21, %v4026_v57  ;;  %v1713_v8 = vmul.f32 %v1687_v21, %v4027_v62  ;;  %v1714_v39 = vmul.f32 %v1687_v21, %v4028_v31 }
 0x4e3   :  { %1739 = vst [vmem:[#allocation16 + $0x40] sm:$0xff] %v1707_v14  ;;  %1740 = vst [vmem:[#allocation16 + $0x48] sm:$0xff] %v1708_v38  ;;  %v1699_v9 = vmul.f32 %v1682_v20, %v4029_v35  ;;  %v1700_v11 = vmul.f32 %v1682_v20, %v4030_v0  ;;  %v1701_v24 = vmul.f32 %v1682_v20, %v4031_v10  ;;  %v4035_v21 = vmax.f32 %v3425_v56, 0.0 }
 0x4e4   :  { %1741 = vst [vmem:[#allocation16 + $0x50] sm:$0xff] %v1709_v15  ;;  %1742 = vst [vmem:[#allocation16 + $0x58] sm:$0xff] %v1710_v30  ;;  %v1702_v29 = vmul.f32 %v1682_v20, %v4032_v42  ;;  %v1703_v27 = vmul.f32 %v1682_v20, %v4033_v50  ;;  %v1704_v59 = vmul.f32 %v1682_v20, %v4034_v26  ;;  %v4036_v12 = vmax.f32 %v3433_v19, 0.0  ;;  %v1697_v14 = vpop.permute.xlu0 %1696 }
 0x4e5   :  { %1743 = vst [vmem:[#allocation16 + $0x60] sm:$0xff] %v1711_v17  ;;  %1744 = vst [vmem:[#allocation16 + $0x68] sm:$0xff] %v1712_v25  ;;  %v1705_v49 = vmul.f32 %v1682_v20, %v4035_v21  ;;  %v1723_v6 = vmul.f32 %v1697_v14, %v4037_v13  ;;  %v1724_v38 = vmul.f32 %v1697_v14, %v4038_v44  ;;  %v4040_v56 = vmax.f32 %v3436_v36, 0.0 }
 0x4e6   :  { %1745 = vst [vmem:[#allocation16 + $0x70] sm:$0xff] %v1713_v8  ;;  %1746 = vst [vmem:[#allocation16 + $0x78] sm:$0xff] %v1714_v39  ;;  %v1706_v46 = vmul.f32 %v1682_v20, %v4036_v12  ;;  %v1725_v2 = vmul.f32 %v1697_v14, %v4039_v45  ;;  %v4041_v19 = vmax.f32 %v3500_v58, 0.0  ;;  %v4042_v30 = vmax.f32 %v3509_v53, 0.0  ;;  %v1797_v17 = vpop.permute.xlu1 %1796  ;;  %v4063_v12 = vld [vmem:[#allocation23_spill] sm:$0xff] }
 0x4e7   :  { %1731 = vst [vmem:[#allocation16] sm:$0xff] %v1699_v9  ;;  %1732 = vst [vmem:[#allocation16 + $0x8] sm:$0xff] %v1700_v11  ;;  %v1726_v15 = vmul.f32 %v1697_v14, %v4040_v56  ;;  %v4043_v20 = vmax.f32 %v3519_v33, 0.0  ;;  %v4044_v55 = vmax.f32 %v3526_v3, 0.0  ;;  %v4045_v36 = vmax.f32 %v3539_v23, 0.0 }
 0x4e8   :  { %1733 = vst [vmem:[#allocation16 + $0x10] sm:$0xff] %v1701_v24  ;;  %1734 = vst [vmem:[#allocation16 + $0x18] sm:$0xff] %v1702_v29  ;;  %v1727_v41 = vmul.f32 %v1697_v14, %v4041_v19  ;;  %v1728_v22 = vmul.f32 %v1697_v14, %v4042_v30  ;;  %v4046_v58 = vmax.f32 %v3542_v63, 0.0  ;;  %v4047_v53 = vmax.f32 %v3553_v43, 0.0  ;;  %v4073_v19 = vld [vmem:[#allocation29_spill] sm:$0xff] }
 0x4e9   :  { %1735 = vst [vmem:[#allocation16 + $0x20] sm:$0xff] %v1703_v27  ;;  %1736 = vst [vmem:[#allocation16 + $0x28] sm:$0xff] %v1704_v59  ;;  %v1729_v40 = vmul.f32 %v1697_v14, %v4043_v20  ;;  %v1730_v1 = vmul.f32 %v1697_v14, %v4044_v55  ;;  %v1811_v57 = vmul.f32 %v1797_v17, %v4045_v36  ;;  %v4048_v33 = vmax.f32 %v3572_v37, 0.0  ;;  %v1801_v37 = vpop.permute.xlu0 %1800  ;;  %v4065_v14 = vld [vmem:[#allocation24_spill] sm:$0xff] }
 0x4ea   :  { %1737 = vst [vmem:[#allocation16 + $0x30] sm:$0xff] %v1705_v49  ;;  %1738 = vst [vmem:[#allocation16 + $0x38] sm:$0xff] %v1706_v46  ;;  %v1812_v25 = vmul.f32 %v1797_v17, %v4046_v58  ;;  %v1813_v62 = vmul.f32 %v1797_v17, %v4047_v53  ;;  %v4049_v3 = vmax.f32 %v3608_v52, 0.0  ;;  %v4050_v39 = vmax.f32 %v3616_v51, 0.0  ;;  %v4081_v53 = vld [vmem:[#allocation33_spill] sm:$0xff] }
 0x4eb   :  { %1755 = vst [vmem:[#allocation16 + $0xc0] sm:$0xff] %v1723_v6  ;;  %1756 = vst [vmem:[#allocation16 + $0xc8] sm:$0xff] %v1724_v38  ;;  %v1814_v8 = vmul.f32 %v1797_v17, %v4048_v33  ;;  %v4051_v35 = vmax.f32 %v3622_v18, 0.0  ;;  %v4052_v9 = vmax.f32 %v3633_v61, 0.0  ;;  %v4053_v52 = vmax.f32 %v3545_v60, 0.0  ;;  %v4067_v6 = vld [vmem:[#allocation26_spill] sm:$0xff] }
 0x4ec   :  { %1757 = vst [vmem:[#allocation16 + $0xd0] sm:$0xff] %v1725_v2  ;;  %1758 = vst [vmem:[#allocation16 + $0xd8] sm:$0xff] %v1726_v15  ;;  %v1815_v31 = vmul.f32 %v1797_v17, %v4049_v3  ;;  %v1816_v23 = vmul.f32 %v1797_v17, %v4050_v39  ;;  %v4054_v51 = vmax.f32 %v3548_v34, 0.0  ;;  %v4055_v18 = vmax.f32 %v3564_v4, 0.0  ;;  %v1692_v34 = vpop.permute.xlu1 %1691  ;;  %v4061_v4 = vld [vmem:[#allocation25_spill] sm:$0xff]  ;;  %v4071_v2 = vld [vmem:[#allocation28_spill] sm:$0xff] }
 0x4ed   :  { %1759 = vst [vmem:[#allocation16 + $0xe0] sm:$0xff] %v1727_v41  ;;  %1760 = vst [vmem:[#allocation16 + $0xe8] sm:$0xff] %v1728_v22  ;;  %v1817_v63 = vmul.f32 %v1797_v17, %v4051_v35  ;;  %v1818_v43 = vmul.f32 %v1797_v17, %v4052_v9  ;;  %v1819_v0 = vmul.f32 %v1801_v37, %v4053_v52  ;;  %v4056_v61 = vmax.f32 %v3585_v28, 0.0  ;;  %v4075_v22 = vld [vmem:[#allocation30_spill] sm:$0xff]  ;;  %v4085_v39 = vld [vmem:[#allocation39_spill] sm:$0xff] }
 0x4ee   :  { %1761 = vst [vmem:[#allocation16 + $0xf0] sm:$0xff] %v1729_v40  ;;  %1762 = vst [vmem:[#allocation16 + $0xf8] sm:$0xff] %v1730_v1  ;;  %v1820_v11 = vmul.f32 %v1801_v37, %v4054_v51  ;;  %v1821_v10 = vmul.f32 %v1801_v37, %v4055_v18  ;;  %v4057_v42 = vmax.f32 %v3636_v48, 0.0  ;;  %v4058_v50 = vmax.f32 %v3647_v5, 0.0  ;;  %v4077_v1 = vld [vmem:[#allocation31_spill] sm:$0xff] }
 0x4ef   :  { %1843 = vst [vmem:[#allocation16 + $0x100] sm:$0xff] %v1811_v57  ;;  %1844 = vst [vmem:[#allocation16 + $0x108] sm:$0xff] %v1812_v25  ;;  %v1822_v24 = vmul.f32 %v1801_v37, %v4056_v61  ;;  %v4059_v26 = vmax.f32 %v3654_v47, 0.0  ;;  %v4060_v60 = vmax.f32 %v3660_v54, 0.0  ;;  %v4062_v28 = vmax.f32 %v4061_v4, 0.0  ;;  %v4069_v54 = vld [vmem:[#allocation27_spill] sm:$0xff] }
 0x4f0   :  { %1845 = vst [vmem:[#allocation16 + $0x110] sm:$0xff] %v1813_v62  ;;  %1846 = vst [vmem:[#allocation16 + $0x118] sm:$0xff] %v1814_v8  ;;  %v1823_v29 = vmul.f32 %v1801_v37, %v4057_v42  ;;  %v1824_v27 = vmul.f32 %v1801_v37, %v4058_v50  ;;  %v4064_v48 = vmax.f32 %v4063_v12, 0.0  ;;  %v4066_v5 = vmax.f32 %v4065_v14, 0.0  ;;  %v1805_v55 = vpop.permute.xlu1 %1804  ;;  %v4079_v57 = vld [vmem:[#allocation32_spill] sm:$0xff] }
 0x4f1   :  { %1847 = vst [vmem:[#allocation16 + $0x120] sm:$0xff] %v1815_v31  ;;  %1848 = vst [vmem:[#allocation16 + $0x128] sm:$0xff] %v1816_v23  ;;  %v1825_v59 = vmul.f32 %v1801_v37, %v4059_v26  ;;  %v1826_v21 = vmul.f32 %v1801_v37, %v4060_v60  ;;  %v1715_v49 = vmul.f32 %v1692_v34, %v4062_v28  ;;  %v4068_v47 = vmax.f32 %v4067_v6, 0.0  ;;  %v4083_v8 = vld [vmem:[#allocation36_spill] sm:$0xff]  ;;  %v4102_v28 = vld [vmem:[#allocation42_spill] sm:$0xff] }
 0x4f2   :  { %1849 = vst [vmem:[#allocation16 + $0x130] sm:$0xff] %v1817_v63  ;;  %1850 = vst [vmem:[#allocation16 + $0x138] sm:$0xff] %v1818_v43  ;;  %v1716_v46 = vmul.f32 %v1692_v34, %v4064_v48  ;;  %v1717_v13 = vmul.f32 %v1692_v34, %v4066_v5  ;;  %v4070_v38 = vmax.f32 %v4069_v54, 0.0  ;;  %v4072_v56 = vmax.f32 %v4071_v2, 0.0  ;;  %v4098_v26 = vld [vmem:[#allocation40_spill] sm:$0xff]  ;;  %v4104_v48 = vld [vmem:[#allocation43_spill] sm:$0xff] }
 0x4f3   :  { %1851 = vst [vmem:[#allocation16 + $0x140] sm:$0xff] %v1819_v0  ;;  %1852 = vst [vmem:[#allocation16 + $0x148] sm:$0xff] %v1820_v11  ;;  %v1718_v44 = vmul.f32 %v1692_v34, %v4068_v47  ;;  %v4074_v41 = vmax.f32 %v4073_v19, 0.0  ;;  %v4076_v20 = vmax.f32 %v4075_v22, 0.0  ;;  %v4078_v17 = vmax.f32 %v4077_v1, 0.0  ;;  %v4090_v11 = vld [vmem:[#allocation34_spill] sm:$0xff] }
 0x4f4   :  { %1853 = vst [vmem:[#allocation16 + $0x150] sm:$0xff] %v1821_v10  ;;  %1854 = vst [vmem:[#allocation16 + $0x158] sm:$0xff] %v1822_v24  ;;  %v1719_v45 = vmul.f32 %v1692_v34, %v4070_v38  ;;  %v1720_v15 = vmul.f32 %v1692_v34, %v4072_v56  ;;  %v4080_v58 = vmax.f32 %v4079_v57, 0.0  ;;  %v4082_v62 = vmax.f32 %v4081_v53, 0.0  ;;  %v1809_v51 = vpop.permute.xlu1 %1808  ;;  %v4092_v10 = vld [vmem:[#allocation35_spill] sm:$0xff]  ;;  %v4094_v24 = vld [vmem:[#allocation37_spill] sm:$0xff] }
 0x4f5   :  { %1855 = vst [vmem:[#allocation16 + $0x160] sm:$0xff] %v1823_v29  ;;  %1856 = vst [vmem:[#allocation16 + $0x168] sm:$0xff] %v1824_v27  ;;  %v1721_v30 = vmul.f32 %v1692_v34, %v4074_v41  ;;  %v1722_v40 = vmul.f32 %v1692_v34, %v4076_v20  ;;  %v1827_v36 = vmul.f32 %v1805_v55, %v4078_v17  ;;  %v4084_v3 = vmax.f32 %v4083_v8, 0.0  ;;  %v4096_v29 = vld [vmem:[#allocation38_spill] sm:$0xff] }
 0x4f6   :  { %1857 = vst [vmem:[#allocation16 + $0x170] sm:$0xff] %v1825_v59  ;;  %1858 = vst [vmem:[#allocation16 + $0x178] sm:$0xff] %v1826_v21  ;;  %v1828_v25 = vmul.f32 %v1805_v55, %v4080_v58  ;;  %v1829_v33 = vmul.f32 %v1805_v55, %v4082_v62  ;;  %v4086_v23 = vmax.f32 %v4085_v39, 0.0  ;;  %v4087_v63 = vmax.f32 %v3677_v32, 0.0  ;;  %v4100_v21 = vld [vmem:[#allocation41_spill] sm:$0xff] }
 0x4f7   :  { %1747 = vst [vmem:[#allocation16 + $0x80] sm:$0xff] %v1715_v49  ;;  %1748 = vst [vmem:[#allocation16 + $0x88] sm:$0xff] %v1716_v46  ;;  %v1830_v31 = vmul.f32 %v1805_v55, %v4084_v3  ;;  %v4088_v43 = vmax.f32 %v3674_v7, 0.0  ;;  %v4089_v52 = vmax.f32 %v3690_v16, 0.0  ;;  %v4091_v32 = vmax.f32 %v4090_v11, 0.0 }
 0x4f8   :  { %1749 = vst [vmem:[#allocation16 + $0x90] sm:$0xff] %v1717_v13  ;;  %1750 = vst [vmem:[#allocation16 + $0x98] sm:$0xff] %v1718_v44  ;;  %v1831_v35 = vmul.f32 %v1805_v55, %v4086_v23  ;;  %v1832_v9 = vmul.f32 %v1805_v55, %v4087_v63  ;;  %v4093_v7 = vmax.f32 %v4092_v10, 0.0  ;;  %v4095_v16 = vmax.f32 %v4094_v24, 0.0 }
 0x4f9   :  { %1751 = vst [vmem:[#allocation16 + $0xa0] sm:$0xff] %v1719_v45  ;;  %1752 = vst [vmem:[#allocation16 + $0xa8] sm:$0xff] %v1720_v15  ;;  %v1833_v37 = vmul.f32 %v1805_v55, %v4088_v43  ;;  %v1834_v0 = vmul.f32 %v1805_v55, %v4089_v52  ;;  %v1835_v18 = vmul.f32 %v1809_v51, %v4091_v32  ;;  %v4097_v50 = vmax.f32 %v4096_v29, 0.0 }
 0x4fa   :  { %1753 = vst [vmem:[#allocation16 + $0xb0] sm:$0xff] %v1721_v30  ;;  %1754 = vst [vmem:[#allocation16 + $0xb8] sm:$0xff] %v1722_v40  ;;  %v1836_v61 = vmul.f32 %v1809_v51, %v4093_v7  ;;  %v1837_v42 = vmul.f32 %v1809_v51, %v4095_v16  ;;  %v4099_v59 = vmax.f32 %v4098_v26, 0.0  ;;  %v4101_v34 = vmax.f32 %v4100_v21, 0.0 }
 0x4fb   :  { %1859 = vst [vmem:[#allocation16 + $0x180] sm:$0xff] %v1827_v36  ;;  %1860 = vst [vmem:[#allocation16 + $0x188] sm:$0xff] %v1828_v25  ;;  %v1838_v27 = vmul.f32 %v1809_v51, %v4097_v50  ;;  %v4103_v49 = vmax.f32 %v4102_v28, 0.0  ;;  %v4105_v46 = vmax.f32 %v4104_v48, 0.0 }
 0x4fc   :  { %1861 = vst [vmem:[#allocation16 + $0x190] sm:$0xff] %v1829_v33  ;;  %1862 = vst [vmem:[#allocation16 + $0x198] sm:$0xff] %v1830_v31  ;;  %v1839_v60 = vmul.f32 %v1809_v51, %v4099_v59  ;;  %v1840_v4 = vmul.f32 %v1809_v51, %v4101_v34 }
 0x4fd   :  { %1863 = vst [vmem:[#allocation16 + $0x1a0] sm:$0xff] %v1831_v35  ;;  %1864 = vst [vmem:[#allocation16 + $0x1a8] sm:$0xff] %v1832_v9  ;;  %v1841_v12 = vmul.f32 %v1809_v51, %v4103_v49  ;;  %v1842_v14 = vmul.f32 %v1809_v51, %v4105_v46 }
 0x4fe   :  { %1865 = vst [vmem:[#allocation16 + $0x1b0] sm:$0xff] %v1833_v37  ;;  %1866 = vst [vmem:[#allocation16 + $0x1b8] sm:$0xff] %v1834_v0 }
 0x4ff   :  { %1867 = vst [vmem:[#allocation16 + $0x1c0] sm:$0xff] %v1835_v18  ;;  %1868 = vst [vmem:[#allocation16 + $0x1c8] sm:$0xff] %v1836_v61 }
 0x500   :  { %1869 = vst [vmem:[#allocation16 + $0x1d0] sm:$0xff] %v1837_v42  ;;  %1870 = vst [vmem:[#allocation16 + $0x1d8] sm:$0xff] %v1838_v27 }
 0x501   :  { %1871 = vst [vmem:[#allocation16 + $0x1e0] sm:$0xff] %v1839_v60  ;;  %1872 = vst [vmem:[#allocation16 + $0x1e8] sm:$0xff] %v1840_v4 }
 0x502   :  { %1873 = vst [vmem:[#allocation16 + $0x1f0] sm:$0xff] %v1841_v12  ;;  %1874 = vst [vmem:[#allocation16 + $0x1f8] sm:$0xff] %v1842_v14 }
 0x503   :  { %2424 = shalt.err (!%p2421_p12)
}
 0x504   :  { %s2425_s17 = scalar_lea.hbm %s3887_s8, 8192 }
 0x505   :  { %p2426_p13 = scmp.ne.s32.totalorder %s3887_s8, %s2425_s17  ;;  %p2429_p0 = scmp.lt.u32.totalorder %s2425_s17, %s3887_s8 }
 0x507   :  { %p2431_p1 = pnand %p2429_p0, %p2426_p13 }
 0x509   :  { %2434 = shalt.err (!%p2431_p1)
}
 0x50a   :  { %1886 = dma.vmem_to_hbm [thread:$0]  %s1881_s28, 8192, %s3887_s8, [#allocation4], %s2448_s15, %s2448_s15, %s2449_s16  }
 0x50b   :  { %2445 = dma.done.wait [#allocation4], 8192  }
 0x50c   :  { %2446 = vsyncadd [#allocation4], 4294959104 }
 0x50d   :  { %1890 = vsyncpa [#allocation3], 1 }
 0x50e   :  { %1891 = vsyncpa [#allocation6], 1 }
 0x50f   :  { %1892 = vsyncpa [#allocation9], 1 }
 0x510   :  { %1893 = vsyncpa [#allocation12], 1 }
 0x511   :  { %1894 = vsyncpa [#allocation15], 1 }
 0x512   :  { %1895 = vsyncpa [#allocation4], 1 }

</bundles_post_ra>
